<compile_context>
chip_gen: v7x
topology: tpu7x:2x2x1
jax: 0.10.0
libtpu: 0.0.40
codegen_flags: <defaults>
</compile_context>

<pallas_src>
import functools

import jax
import jax.numpy as jnp
from jax.experimental import pallas as pl
from jax.experimental.pallas import tpu as pltpu


def _round_up(n, m):
    return ((n + m - 1) // m) * m


def _pick_block_b(B, desired=512, cap=1024):
    """Pick a batch tile: as large as useful (mem-bound kernel), multiple of
    128 for full MXU rows, but never so large that the grid drops below 2
    steps when B > 128 (keeps both v7x TensorCores busy)."""
    if B <= 128:
        return 128
    half = _round_up((B + 1) // 2, 128)   # largest tile that still yields >=2 steps
    return max(128, min(desired, half, cap))


def _fc_softmax_kernel(x_ref, w1_ref, b1_ref, w2_ref, b2_ref, o_ref):
    # relu(proj(x)) with proj == Identity.  Relu in f32 on the VPU (v5e has no
    # bf16 VALU); cast to bf16 only as the MXU operand.
    x = jnp.maximum(x_ref[...], 0.0).astype(jnp.bfloat16)
    # fc1: bf16 x bf16 -> f32 accumulation on the MXU; bias + relu in f32.
    h = jnp.dot(x, w1_ref[...], preferred_element_type=jnp.float32) + b1_ref[...]
    h = jnp.maximum(h, 0.0)
    # fc2 on the lane-padded class dim (C_pad = 128): logits only — softmax is
    # applied by the loss in the reference training script.
    logits = jnp.dot(h.astype(jnp.bfloat16), w2_ref[...],
                     preferred_element_type=jnp.float32) + b2_ref[...]
    # bf16 writeback: the class dim is mostly lane padding, so halving the
    # store bytes is a real saving in a mem-bound kernel.
    o_ref[...] = logits.astype(o_ref.dtype)


@functools.partial(jax.jit, static_argnames=("block_b",))
def fc_softmax_classifier(x, w1, b1, w2, b2, *, block_b=None):
    """Forward pass of FCSoftmaxClassifier (proj_method='pca').

    x:  (B, proj_dim) float32/bfloat16
    w1: (proj_dim, hidden)      [transposed vs PyTorch's (out, in)]
    b1: (hidden,)
    w2: (hidden, num_classes)   [transposed vs PyTorch]
    b2: (num_classes,)
    Returns (B, num_classes) float32 logits.
    """
    B, D = x.shape
    H = w1.shape[1]
    C = w2.shape[1]

    # Lane-dense class padding (multiple of 128) so the output store is a full
    # unmasked vst and fc2 uses full MXU columns; sliced off in the wrapper.
    C_pad = _round_up(max(C, 128), 128)

    if block_b is None:
        block_b = _pick_block_b(B)
    grid_b = pl.cdiv(B, block_b)   # ragged last tile handled by Pallas

    # Weights as bf16 MXU operands (f32 accumulation in-kernel); biases f32.
    w1_p = w1.astype(jnp.bfloat16)
    w2_p = jnp.pad(w2.astype(jnp.float32), ((0, 0), (0, C_pad - C))).astype(jnp.bfloat16)
    b1_p = b1.reshape(1, H).astype(jnp.float32)
    b2_p = jnp.pad(b2.reshape(1, C).astype(jnp.float32), ((0, 0), (0, C_pad - C)))

    x_p = x.astype(jnp.float32)    # no-op if already f32; cast to bf16 is in-kernel

    flops = 2 * B * D * H + 2 * B * H * C_pad
    bytes_accessed = (x_p.size * 4 + w1_p.size * 2 + w2_p.size * 2
                      + b1_p.size * 4 + b2_p.size * 4 + B * C_pad * 2)

    out = pl.pallas_call(
        _fc_softmax_kernel,
        out_shape=jax.ShapeDtypeStruct((B, C_pad), jnp.bfloat16),
        grid_spec=pltpu.PrefetchScalarGridSpec(
            num_scalar_prefetch=0,
            grid=(grid_b,),
            in_specs=[
                pl.BlockSpec((block_b, D), lambda i: (i, 0)),   # x tile (streamed, f32)
                pl.BlockSpec((D, H), lambda i: (0, 0)),         # w1 (grid-invariant)
                pl.BlockSpec((1, H), lambda i: (0, 0)),         # b1
                pl.BlockSpec((H, C_pad), lambda i: (0, 0)),     # w2 (lane-padded)
                pl.BlockSpec((1, C_pad), lambda i: (0, 0)),     # b2
            ],
            out_specs=pl.BlockSpec((block_b, C_pad), lambda i: (i, 0)),
        ),
        compiler_params=pltpu.CompilerParams(
            dimension_semantics=("parallel",)),
        cost_estimate=pl.CostEstimate(
            flops=flops, transcendentals=0, bytes_accessed=bytes_accessed),
    )(x_p, w1_p, b1_p, w2_p, b2_p)

    # Strip class padding; upcast the tiny (B, C) slice to f32 for the caller.
    return out[:, :C].astype(jnp.float32)


def reference_forward_f32(x, w1, b1, w2, b2):
    x = jnp.maximum(x, 0.0)                 # relu(Identity(x))
    h = jnp.maximum(x @ w1 + b1, 0.0)       # relu(fc1(x))
    return h @ w2 + b2                      # fc2 (logits)


def reference_forward_bf16(x, w1, b1, w2, b2):
    # Same numerics as the kernel: relu in f32, bf16 MXU operands, f32
    # accumulation, bf16 final store.
    xb = jnp.maximum(x, 0.0).astype(jnp.bfloat16)
    h = jnp.dot(xb, w1.astype(jnp.bfloat16),
                preferred_element_type=jnp.float32) + b1
    h = jnp.maximum(h, 0.0)
    logits = jnp.dot(h.astype(jnp.bfloat16), w2.astype(jnp.bfloat16),
                     preferred_element_type=jnp.float32) + b2
    return logits.astype(jnp.bfloat16).astype(jnp.float32)


if __name__ == "__main__":
    # Module's actual layer dims (proj_dim=1280, hidden_dim=256, num_classes=2).
    # Batch deliberately NOT a multiple of 128 to exercise the ragged-edge
    # path (no explicit padding of x); block_b auto-picks 128 -> grid=(2,),
    # so v7x's two TensorCores each get a tile.
    batch = 200
    proj_dim = 1280
    hidden_dim = 256
    num_classes = 2
    # proj_method = 'pca' -> Identity projection, nothing to initialize.
    # TODO(synk): proj_method='fc' would add one more Linear (input_dim->proj_dim);
    # not exercised because the reference script configures proj_method='pca'.

    key = jax.random.PRNGKey(0)
    kx, k1, k2, k3, k4 = jax.random.split(key, 5)

    x = jax.random.normal(kx, (batch, proj_dim), dtype=jnp.float32)

    # Deterministic parameter init (uniform, roughly PyTorch Linear scale).
    lim1 = 1.0 / (proj_dim ** 0.5)
    lim2 = 1.0 / (hidden_dim ** 0.5)
    w1 = jax.random.uniform(k1, (proj_dim, hidden_dim), jnp.float32, -lim1, lim1)
    b1 = jax.random.uniform(k2, (hidden_dim,), jnp.float32, -lim1, lim1)
    w2 = jax.random.uniform(k3, (hidden_dim, num_classes), jnp.float32, -lim2, lim2)
    b2 = jax.random.uniform(k4, (num_classes,), jnp.float32, -lim2, lim2)

    out = fc_softmax_classifier(x, w1, b1, w2, b2)
    out = jax.block_until_ready(out)
    assert out.shape == (batch, num_classes)
    assert bool(jnp.all(jnp.isfinite(out)))

    # Tight check vs a reference with matching bf16-MXU / f32-accumulate /
    # bf16-store numerics, plus a looser sanity check vs the pure-f32 forward.
    ref_bf16 = reference_forward_bf16(x, w1, b1, w2, b2)
    ref_f32 = reference_forward_f32(x, w1, b1, w2, b2)
    assert jnp.allclose(out, ref_bf16, atol=2e-2, rtol=2e-2), "mismatch vs bf16 reference"
    assert jnp.allclose(out, ref_f32, atol=1e-1, rtol=1e-1), "mismatch vs f32 reference"

    print("KERNEL_OK")
</pallas_src>

<mosaic_0001>
module attributes {stable_mosaic.version = 11 : i64} {
  func.func @_fc_softmax_kernel(%arg0: i32, %arg1: memref<128x1280xf32, #tpu.memory_space<vmem>>, %arg2: memref<1280x256xbf16, #tpu.memory_space<vmem>>, %arg3: memref<1x256xf32, #tpu.memory_space<vmem>>, %arg4: memref<256x128xbf16, #tpu.memory_space<vmem>>, %arg5: memref<1x128xf32, #tpu.memory_space<vmem>>, %arg6: memref<128x128xbf16, #tpu.memory_space<vmem>>) attributes {dimension_semantics = [#tpu.dimension_semantics<parallel>], iteration_bounds = array<i64: 2>, scalar_prefetch = 0 : i64, scratch_operands = 0 : i64, tpu.core_type = #tpu.core_type<tc>, window_params = [{transform_indices = @transform_0, window_bounds = array<i64: 128, 1280>}, {pipeline_mode = #tpu.pipeline_mode<synchronous>, transform_indices = @transform_1, window_bounds = array<i64: 1280, 256>}, {pipeline_mode = #tpu.pipeline_mode<synchronous>, transform_indices = @transform_2, window_bounds = array<i64: 1, 256>}, {pipeline_mode = #tpu.pipeline_mode<synchronous>, transform_indices = @transform_3, window_bounds = array<i64: 256, 128>}, {pipeline_mode = #tpu.pipeline_mode<synchronous>, transform_indices = @transform_4, window_bounds = array<i64: 1, 128>}, {transform_indices = @transform_5, window_bounds = array<i64: 128, 128>}]} {
    %c0 = arith.constant 0 : index
    %c0_0 = arith.constant 0 : index
    %0 = vector.load %arg1[%c0, %c0_0] : memref<128x1280xf32, #tpu.memory_space<vmem>>, vector<128x1280xf32>
    %cst = arith.constant 0.000000e+00 : f32
    %1 = vector.broadcast %cst : f32 to vector<128x1280xf32>
    %2 = arith.maximumf %0, %1 : vector<128x1280xf32>
    %3 = arith.truncf %2 : vector<128x1280xf32> to vector<128x1280xbf16>
    %c0_1 = arith.constant 0 : index
    %c0_2 = arith.constant 0 : index
    %4 = vector.load %arg2[%c0_1, %c0_2] : memref<1280x256xbf16, #tpu.memory_space<vmem>>, vector<1280x256xbf16>
    %cst_3 = arith.constant dense<0.000000e+00> : vector<128x256xf32>
    %5 = tpu.matmul %3, %4, %cst_3 {dimension_numbers = #tpu.dot_dimension_numbers<[1], [0], [0], [1], [0, 0, 1, 1], [], []>} : vector<128x1280xbf16>, vector<1280x256xbf16>, vector<128x256xf32> -> vector<128x256xf32>
    %c0_4 = arith.constant 0 : index
    %c0_5 = arith.constant 0 : index
    %6 = vector.load %arg3[%c0_4, %c0_5] : memref<1x256xf32, #tpu.memory_space<vmem>>, vector<1x256xf32>
    %7 = vector.broadcast %6 : vector<1x256xf32> to vector<128x256xf32>
    %8 = arith.addf %5, %7 : vector<128x256xf32>
    %cst_6 = arith.constant 0.000000e+00 : f32
    %9 = vector.broadcast %cst_6 : f32 to vector<128x256xf32>
    %10 = arith.maximumf %8, %9 : vector<128x256xf32>
    %11 = arith.truncf %10 : vector<128x256xf32> to vector<128x256xbf16>
    %c0_7 = arith.constant 0 : index
    %c0_8 = arith.constant 0 : index
    %12 = vector.load %arg4[%c0_7, %c0_8] : memref<256x128xbf16, #tpu.memory_space<vmem>>, vector<256x128xbf16>
    %cst_9 = arith.constant dense<0.000000e+00> : vector<128x128xf32>
    %13 = tpu.matmul %11, %12, %cst_9 {dimension_numbers = #tpu.dot_dimension_numbers<[1], [0], [0], [1], [0, 0, 1, 1], [], []>} : vector<128x256xbf16>, vector<256x128xbf16>, vector<128x128xf32> -> vector<128x128xf32>
    %c0_10 = arith.constant 0 : index
    %c0_11 = arith.constant 0 : index
    %14 = vector.load %arg5[%c0_10, %c0_11] : memref<1x128xf32, #tpu.memory_space<vmem>>, vector<1x128xf32>
    %15 = vector.broadcast %14 : vector<1x128xf32> to vector<128x128xf32>
    %16 = arith.addf %13, %15 : vector<128x128xf32>
    %17 = arith.truncf %16 : vector<128x128xf32> to vector<128x128xbf16>
    %c0_12 = arith.constant 0 : index
    %c0_13 = arith.constant 0 : index
    %18 = vector.load %arg6[%c0_12, %c0_13] : memref<128x128xbf16, #tpu.memory_space<vmem>>, vector<128x128xbf16>
    tpu.vector_store %arg6[%c0_12, %c0_13], %17 {strides = array<i32>} : memref<128x128xbf16, #tpu.memory_space<vmem>>, vector<128x128xbf16>,
    return
  }
  func.func @transform_0(%arg0: i32) -> (i32, i32) {
    %c0_i32 = arith.constant 0 : i32
    %c0_i32_0 = arith.constant 0 : i32
    return %arg0, %c0_i32 : i32, i32
  }
  func.func @transform_1(%arg0: i32) -> (i32, i32) {
    %c0_i32 = arith.constant 0 : i32
    %c0_i32_0 = arith.constant 0 : i32
    %c0_i32_1 = arith.constant 0 : i32
    return %c0_i32, %c0_i32_0 : i32, i32
  }
  func.func @transform_2(%arg0: i32) -> (i32, i32) {
    %c0_i32 = arith.constant 0 : i32
    %c0_i32_0 = arith.constant 0 : i32
    %c0_i32_1 = arith.constant 0 : i32
    return %c0_i32, %c0_i32_0 : i32, i32
  }
  func.func @transform_3(%arg0: i32) -> (i32, i32) {
    %c0_i32 = arith.constant 0 : i32
    %c0_i32_0 = arith.constant 0 : i32
    %c0_i32_1 = arith.constant 0 : i32
    return %c0_i32, %c0_i32_0 : i32, i32
  }
  func.func @transform_4(%arg0: i32) -> (i32, i32) {
    %c0_i32 = arith.constant 0 : i32
    %c0_i32_0 = arith.constant 0 : i32
    %c0_i32_1 = arith.constant 0 : i32
    return %c0_i32, %c0_i32_0 : i32, i32
  }
  func.func @transform_5(%arg0: i32) -> (i32, i32) {
    %c0_i32 = arith.constant 0 : i32
    %c0_i32_0 = arith.constant 0 : i32
    return %arg0, %c0_i32 : i32, i32
  }
}

</mosaic_0001>

<bundles_post_ra>
// kernel: fc_softmax_classifier.1
= control target key start
LH: loop header
LB: loop body
LE: loop exit
PB: predicated region body
PF: predicated region fallthrough
CT: control target
= control target key end

     0   :  { %s3796_s18 = smov 0   ;;  %s3798_s19 = smov 0   ;;  %s4769_s0 = inlined_call_operand.vmem [shape: f32[200,1280], index: 0, kind: input, shape index: {}]   ;;  %s4770_s1 = inlined_call_operand.vmem [shape: bf16[1280,256], index: 1, kind: input, shape index: {}]   ;;  %s4771_s2 = inlined_call_operand.vmem [shape: f32[1,256], index: 2, kind: input, shape index: {}]   ;;  %s4772_s3 = inlined_call_operand.vmem [shape: bf16[256,128], index: 3, kind: input, shape index: {}]   ;;  %s4773_s4 = inlined_call_operand.vmem [shape: f32[1,128], index: 4, kind: input, shape index: {}]   ;;  %s4774_s5 = inlined_call_operand.vmem [shape: bf16[200,128], index: 5, kind: output, shape index: {}]  }
   0x1   :  { %s3800_s20 = smov 0  }
   0x2 LB: > { %s3809_s21 = sadd.s32 4294967295, %s3732_s20   ;;  %s3811_s22 = sadd.s32 1, %s3732_s20   ;;  %s3732_s20 = sphi %s3800_s20, %s4781_s20   ;;  %s3728_s19 = sphi %s3798_s19, %s4780_s19   ;;  %s3724_s18 = sphi %s3796_s18, %s4779_s18  }
   0x3   : > { %s129_s23 = ssub.s32 %s3732_s20, %s3811_s22  ;;  %s132_s24 = sadd.s32 1, %s3728_s19 }
   0x4   : > { %p130_p0 = scmp.eq.s32.totalorder %s129_s23, 0  ;;  %p142_p1 = scmp.ne.s32.totalorder %s3728_s19, %s3724_s18 }
   0x5   : > { %p143_p2 = scmp.eq.s32.totalorder %s3809_s21, 1  ;;  %p2829_p3 = scmp.ge.s32.totalorder %s3732_s20, 1 }
   0x6   : > { %s3819_s25 = scalar_select %p130_p0, %s3728_s19, %s132_s24  }
   0x7   : > { %p3821_p4 = por %p143_p2, %p142_p1  ;;  %p199_p5 = scmp.lt.s32.totalorder %s3732_s20, 3 }
   0x9   : > { %p200_p6 = pnand %p2829_p3, %p199_p5 }
   0xa   : > { %v3422_v0 = vld [vmem:[%s4770_s1 + $0x4] ss:$8 sps:$4 sm:$0xff] (!%p200_p6)   ;;  %v3426_v2 = vld [vmem:[%s4770_s1] ss:$8 sps:$4 sm:$0xff] (!%p200_p6)   ;;  %v3428_v4 = vld [vmem:[%s4770_s1 + $0x14] ss:$8 sps:$4 sm:$0xff] (!%p200_p6)  }
   0xb   : > { %203 = sbr.rel (%p200_p6) target bundleno = 763 (0x2fb), region = 40  ;;  %v3424_v1 = vld [vmem:[%s4770_s1 + $0x204] ss:$8 sps:$4 sm:$0xff] (!%p200_p6)   ;;  %1627 = vmatprep.subr.bf16.mxu1 (!%p200_p6), %v3422_v0  ;;  %v3427_v3 = vld [vmem:[%s4770_s1 + $0x200] ss:$8 sps:$4 sm:$0xff] (!%p200_p6)   ;;  %s3913_s28 = sshll.u32 (!%p200_p6), %s3809_s21, 4 }
   0xc   : > { %1853 = vmatprep.subr.bf16.mxu0 (!%p200_p6), %v3424_v1  ;;  %1628 = vmatpush1.bf16.msra.mxu1 (!%p200_p6), %v3426_v2  ;;  %v3430_v5 = vld [vmem:[%s4770_s1 + $0x214] ss:$8 sps:$4 sm:$0xff] (!%p200_p6)   ;;  %v3432_v6 = vld [vmem:[%s4770_s1 + $0x10] ss:$8 sps:$4 sm:$0xff] (!%p200_p6)   ;;  %v3434_v8 = vld [vmem:[%s4770_s1 + $0x24] ss:$8 sps:$4 sm:$0xff] (!%p200_p6)  }
   0xd   : > { %1854 = vmatpush1.bf16.msra.mxu0 (!%p200_p6), %v3427_v3  ;;  %1629 = vmatprep.subr.bf16.mxu1 (!%p200_p6), %v3428_v4  ;;  %v3433_v7 = vld [vmem:[%s4770_s1 + $0x210] ss:$8 sps:$4 sm:$0xff] (!%p200_p6)   ;;  %v3436_v9 = vld [vmem:[%s4770_s1 + $0x224] ss:$8 sps:$4 sm:$0xff] (!%p200_p6)   ;;  %v3438_v10 = vld [vmem:[%s4770_s1 + $0x20] ss:$8 sps:$4 sm:$0xff] (!%p200_p6)  }
   0xe   : > { %1855 = vmatprep.subr.bf16.mxu0 (!%p200_p6), %v3430_v5  ;;  %v3439_v11 = vld [vmem:[%s4770_s1 + $0x220] ss:$8 sps:$4 sm:$0xff] (!%p200_p6)   ;;  %v3440_v12 = vld [vmem:[%s4770_s1 + $0x34] ss:$8 sps:$4 sm:$0xff] (!%p200_p6)   ;;  %v3444_v14 = vld [vmem:[%s4770_s1 + $0x30] ss:$8 sps:$4 sm:$0xff] (!%p200_p6)  }
   0xf   : > { %v3442_v13 = vld [vmem:[%s4770_s1 + $0x234] ss:$8 sps:$4 sm:$0xff] (!%p200_p6)   ;;  %v3445_v15 = vld [vmem:[%s4770_s1 + $0x230] ss:$8 sps:$4 sm:$0xff] (!%p200_p6)   ;;  %v3446_v16 = vld [vmem:[%s4770_s1 + $0x44] ss:$8 sps:$4 sm:$0xff] (!%p200_p6)  }
  0x10   : > { %1630 = vmatpush1.bf16.msra.mxu1 (!%p200_p6), %v3432_v6  ;;  %v3448_v17 = vld [vmem:[%s4770_s1 + $0x244] ss:$8 sps:$4 sm:$0xff] (!%p200_p6)   ;;  %v3450_v18 = vld [vmem:[%s4770_s1 + $0x40] ss:$8 sps:$4 sm:$0xff] (!%p200_p6)   ;;  %v3452_v20 = vld [vmem:[%s4770_s1 + $0x54] ss:$8 sps:$4 sm:$0xff] (!%p200_p6)  }
  0x11   : > { %1856 = vmatpush1.bf16.msra.mxu0 (!%p200_p6), %v3433_v7  ;;  %1631 = vmatprep.subr.bf16.mxu1 (!%p200_p6), %v3434_v8  ;;  %v3451_v19 = vld [vmem:[%s4770_s1 + $0x240] ss:$8 sps:$4 sm:$0xff] (!%p200_p6)   ;;  %v3454_v21 = vld [vmem:[%s4770_s1 + $0x254] ss:$8 sps:$4 sm:$0xff] (!%p200_p6)   ;;  %v3456_v22 = vld [vmem:[%s4770_s1 + $0x50] ss:$8 sps:$4 sm:$0xff] (!%p200_p6)  }
  0x12   : > { %1857 = vmatprep.subr.bf16.mxu0 %v3436_v9  ;;  %v3457_v23 = vld [vmem:[%s4770_s1 + $0x250] ss:$8 sps:$4 sm:$0xff]   ;;  %v3458_v24 = vld [vmem:[%s4770_s1 + $0x64] ss:$8 sps:$4 sm:$0xff]   ;;  %v3462_v26 = vld [vmem:[%s4770_s1 + $0x60] ss:$8 sps:$4 sm:$0xff]  }
  0x13   : > { %v3460_v25 = vld [vmem:[%s4770_s1 + $0x264] ss:$8 sps:$4 sm:$0xff]   ;;  %v3463_v27 = vld [vmem:[%s4770_s1 + $0x260] ss:$8 sps:$4 sm:$0xff]   ;;  %v3464_v28 = vld [vmem:[%s4770_s1 + $0x74] ss:$8 sps:$4 sm:$0xff]  }
  0x14   : > { %1632 = vmatpush1.bf16.msra.mxu1 %v3438_v10  ;;  %v3466_v29 = vld [vmem:[%s4770_s1 + $0x274] ss:$8 sps:$4 sm:$0xff]   ;;  %v3468_v30 = vld [vmem:[%s4770_s1 + $0x70] ss:$8 sps:$4 sm:$0xff]   ;;  %p238_p7 = scmp.lt.s32.totalorder %s3913_s28, 24  ;;  %s229_s12 = sand.u32 1, %s3724_s18  }
  0x15   : > { %1858 = vmatpush1.bf16.msra.mxu0 %v3439_v11  ;;  %1633 = vmatprep.subr.bf16.mxu1 %v3440_v12  ;;  %v3469_v31 = vld [vmem:[%s4770_s1 + $0x270] ss:$8 sps:$4 sm:$0xff]   ;;  %v3470_v32 = vld [vmem:[%s4770_s1 + $0x84] ss:$8 sps:$4 sm:$0xff]   ;;  %v3474_v34 = vld [vmem:[%s4770_s1 + $0x80] ss:$8 sps:$4 sm:$0xff]  }
  0x16   : > { %1859 = vmatprep.subr.bf16.mxu0 %v3442_v13  ;;  %v3472_v33 = vld [vmem:[%s4770_s1 + $0x284] ss:$8 sps:$4 sm:$0xff]   ;;  %v3475_v35 = vld [vmem:[%s4770_s1 + $0x280] ss:$8 sps:$4 sm:$0xff]   ;;  %s239_s20 = scalar_select %p238_p7, %s3913_s28, 24 }
  0x17   : > { %v3476_v36 = vld [vmem:[%s4770_s1 + $0x94] ss:$8 sps:$4 sm:$0xff]   ;;  %v3480_v38 = vld [vmem:[%s4770_s1 + $0x90] ss:$8 sps:$4 sm:$0xff]   ;;  %v3482_v40 = vld [vmem:[%s4770_s1 + $0xa4] ss:$8 sps:$4 sm:$0xff]  }
  0x18   : > { %1634 = vmatpush1.bf16.msra.mxu1 %v3444_v14  ;;  %v3478_v37 = vld [vmem:[%s4770_s1 + $0x294] ss:$8 sps:$4 sm:$0xff]   ;;  %s3333_s7 = smul.u32 80, %s239_s20  ;;  %v3481_v39 = vld [vmem:[%s4770_s1 + $0x290] ss:$8 sps:$4 sm:$0xff]   ;;  %s2830_s15 = sshll.u32 %s229_s12, 6 }
  0x19   : > { %1860 = vmatpush1.bf16.msra.mxu0 %v3445_v15  ;;  %1635 = vmatprep.subr.bf16.mxu1 %v3446_v16  ;;  %v3484_v41 = vld [vmem:[%s4770_s1 + $0x2a4] ss:$8 sps:$4 sm:$0xff]   ;;  %v3486_v42 = vld [vmem:[%s4770_s1 + $0xa0] ss:$8 sps:$4 sm:$0xff]   ;;  %v3488_v44 = vld [vmem:[%s4770_s1 + $0xb4] ss:$8 sps:$4 sm:$0xff]  }
  0x1a   : > { %1861 = vmatprep.subr.bf16.mxu0 %v3448_v17  ;;  %v3487_v43 = vld [vmem:[%s4770_s1 + $0x2a0] ss:$8 sps:$4 sm:$0xff]   ;;  %s3965_s24 = scalar_lea.vmem %s4769_s0, %s3333_s7  ;;  %v3490_v45 = vld [vmem:[%s4770_s1 + $0x2b4] ss:$8 sps:$4 sm:$0xff]   ;;  %v3492_v46 = vld [vmem:[%s4770_s1 + $0xb0] ss:$8 sps:$4 sm:$0xff]  }
  0x1b   : > { %v256_v47 = vld [vmem:[%s3965_s24 + $0x8] sm:$0xff]  ;;  %v266_v48 = vld [vmem:[%s3965_s24 + $0x58] sm:$0xff]  ;;  %v255_v6 = vld [vmem:[%s3965_s24] sm:$0xff]  ;;  %s4642_s16 = scalar_lea.vmem [#allocation2], %s2830_s15   ;;  %s2560_s18 = ssub.s32 (%p3821_p4), 25, %s3913_s28 }
  0x1c   : > { %1636 = vmatpush1.bf16.msra.mxu1 %v3450_v18  ;;  %v416_v49 = vmax.f32 %v256_v47, 0.0  ;;  %v260_v50 = vld [vmem:[%s3965_s24 + $0x28] sm:$0xff]  ;;  %v270_v51 = vld [vmem:[%s3965_s24 + $0x78] sm:$0xff]  ;;  %v426_v53 = vmax.f32 %v266_v48, 0.0  ;;  %v265_v8 = vld [vmem:[%s3965_s24 + $0x50] sm:$0xff]  ;;  %v415_v12 = vmax.f32 %v255_v6, 0.0 }
  0x1d   : > { %1862 = vmatpush1.bf16.msra.mxu0 %v3451_v19  ;;  %1637 = vmatprep.subr.bf16.mxu1 %v3452_v20  ;;  %v3493_v52 = vld [vmem:[%s4770_s1 + $0x2b0] ss:$8 sps:$4 sm:$0xff]   ;;  %v420_v54 = vmax.f32 %v260_v50, 0.0  ;;  %v430_v55 = vmax.f32 %v270_v51, 0.0  ;;  %v3494_v56 = vld [vmem:[%s4770_s1 + $0xc4] ss:$8 sps:$4 sm:$0xff]  }
  0x1e   : > { %1863 = vmatprep.subr.bf16.mxu0 %v3454_v21  ;;  %v3496_v57 = vld [vmem:[%s4770_s1 + $0x2c4] ss:$8 sps:$4 sm:$0xff]   ;;  %v576_v58 = vpack.c.bf16 %v426_v53, %v416_v49  ;;  %v3498_v60 = vld [vmem:[%s4770_s1 + $0xc0] ss:$8 sps:$4 sm:$0xff]   ;;  %v3500_v62 = vld [vmem:[%s4770_s1 + $0xd4] ss:$8 sps:$4 sm:$0xff]  }
  0x1f   : > { %v580_v59 = vpack.c.bf16 %v430_v55, %v420_v54  ;;  %v3499_v61 = vld [vmem:[%s4770_s1 + $0x2c0] ss:$8 sps:$4 sm:$0xff]   ;;  %v3502_v63 = vld [vmem:[%s4770_s1 + $0x2d4] ss:$8 sps:$4 sm:$0xff]   ;;  %v3504_v0 = vld [vmem:[%s4770_s1 + $0xd0] ss:$8 sps:$4 sm:$0xff]  }
  0x20   : > { %1638 = vmatpush1.bf16.msra.mxu1 %v3456_v22  ;;  %1659 = vmatprep.mubr.bf16.mxu1 %v576_v58  ;;  %v3505_v1 = vld [vmem:[%s4770_s1 + $0x2d0] ss:$8 sps:$4 sm:$0xff]   ;;  %v3506_v2 = vld [vmem:[%s4770_s1 + $0xe4] ss:$8 sps:$4 sm:$0xff]   ;;  %v3510_v4 = vld [vmem:[%s4770_s1 + $0xe0] ss:$8 sps:$4 sm:$0xff]  }
  0x21   : > { %1864 = vmatpush1.bf16.msra.mxu0 %v3457_v23  ;;  %1639 = vmatprep.subr.bf16.mxu1 %v3458_v24  ;;  %v3508_v3 = vld [vmem:[%s4770_s1 + $0x2e4] ss:$8 sps:$4 sm:$0xff]   ;;  %v3511_v5 = vld [vmem:[%s4770_s1 + $0x2e0] ss:$8 sps:$4 sm:$0xff]   ;;  %v3512_v7 = vld [vmem:[%s4770_s1 + $0xf4] ss:$8 sps:$4 sm:$0xff]  }
  0x22   : > { %1865 = vmatprep.subr.bf16.mxu0 %v3460_v25  ;;  %1885 = vmatprep.mubr.bf16.mxu0 %v580_v59  ;;  %v259_v9 = vld [vmem:[%s3965_s24 + $0x20] sm:$0xff]  ;;  %v269_v10 = vld [vmem:[%s3965_s24 + $0x70] sm:$0xff]  ;;  %v276_v13 = vld [vmem:[%s3965_s24 + $0xa8] sm:$0xff]  ;;  %v425_v14 = vmax.f32 %v265_v8, 0.0  ;;  %s3059_s17 = sshll.u32 (%p3821_p4), %s3809_s21, 6  ;;  %p2561_p8 = scmp.lt.s32.totalorder (%p3821_p4), %s2560_s18, 16 }
  0x23   : > { %v3514_v11 = vld [vmem:[%s4770_s1 + $0x2f4] ss:$8 sps:$4 sm:$0xff]   ;;  %v419_v15 = vmax.f32 %v259_v9, 0.0  ;;  %v429_v16 = vmax.f32 %v269_v10, 0.0  ;;  %v280_v18 = vld [vmem:[%s3965_s24 + $0xc8] sm:$0xff]  ;;  %v295_v58 = vld [vmem:[%s3965_s24 + $0x140] sm:$0xff]  ;;  %s4673_s27 = scalar_lea.vmem (%p3821_p4), %s4774_s5, %s3059_s17  }
  0x24   : > { %1640 = vmatpush1.bf16.msra.mxu1 %v3462_v26  ;;  %v286_v17 = vld [vmem:[%s3965_s24 + $0xf8] sm:$0xff]  ;;  %v3520_v22 = vld [vmem:[%s4770_s1 + $0x104] ss:$8 sps:$4 sm:$0xff]   ;;  %v3518_v24 = vld [vmem:[%s4770_s1 + $0x100] ss:$8 sps:$4 sm:$0xff]   ;;  %v436_v26 = vmax.f32 %v276_v13, 0.0 }
  0x25   : > { %1866 = vmatpush1.bf16.msra.mxu0 %v3463_v27  ;;  %1641 = vmatprep.subr.bf16.mxu1 %v3464_v28  ;;  %v290_v19 = vld [vmem:[%s3965_s24 + $0x118] sm:$0xff]  ;;  %v3523_v23 = vld [vmem:[%s4770_s1 + $0x304] ss:$8 sps:$4 sm:$0xff]   ;;  %v3521_v25 = vld [vmem:[%s4770_s1 + $0x300] ss:$8 sps:$4 sm:$0xff]   ;;  %v446_v27 = vmax.f32 %v286_v17, 0.0 }
  0x26   : > { %1867 = vmatprep.subr.bf16.mxu0 %v3466_v29  ;;  %v3516_v20 = vld [vmem:[%s4770_s1 + $0xf0] ss:$8 sps:$4 sm:$0xff]   ;;  %v440_v28 = vmax.f32 %v280_v18, 0.0  ;;  %v450_v29 = vmax.f32 %v290_v19, 0.0  ;;  %v3532_v50 = vld [vmem:[%s4770_s1 + $0x124] ss:$8 sps:$4 sm:$0xff]  }
  0x27   : > { %v3517_v21 = vld [vmem:[%s4770_s1 + $0x2f0] ss:$8 sps:$4 sm:$0xff]   ;;  %v3535_v51 = vld [vmem:[%s4770_s1 + $0x324] ss:$8 sps:$4 sm:$0xff]   ;;  %v3533_v53 = vld [vmem:[%s4770_s1 + $0x320] ss:$8 sps:$4 sm:$0xff]  }
  0x28   : > { %1642 = vmatpush1.bf16.msra.mxu1 %v3468_v30  ;;  %v275_v30 = vld [vmem:[%s3965_s24 + $0xa0] sm:$0xff]  ;;  %v310_v47 = vld [vmem:[%s3965_s24 + $0x1b8] sm:$0xff]  ;;  %v320_v10 = vld [vmem:[%s3965_s24 + $0x208] sm:$0xff] }
  0x29   : > { %1868 = vmatpush1.bf16.msra.mxu0 %v3469_v31  ;;  %1643 = vmatprep.subr.bf16.mxu1 %v3470_v32  ;;  %v575_v31 = vpack.c.bf16 %v425_v14, %v415_v12  ;;  %v579_v32 = vpack.c.bf16 %v429_v16, %v419_v15  ;;  %v3524_v48 = vld [vmem:[%s4770_s1 + $0x110] ss:$8 sps:$4 sm:$0xff]   ;;  %v3544_v14 = vld [vmem:[%s4770_s1 + $0x144] ss:$8 sps:$4 sm:$0xff]   ;;  %v3542_v16 = vld [vmem:[%s4770_s1 + $0x140] ss:$8 sps:$4 sm:$0xff]  }
  0x2a   : > { %1869 = vmatprep.subr.bf16.mxu0 %v3472_v33  ;;  %v3526_v33 = vld [vmem:[%s4770_s1 + $0x114] ss:$8 sps:$4 sm:$0xff]   ;;  %v3527_v49 = vld [vmem:[%s4770_s1 + $0x310] ss:$8 sps:$4 sm:$0xff]   ;;  %v3547_v15 = vld [vmem:[%s4770_s1 + $0x344] ss:$8 sps:$4 sm:$0xff]  }
  0x2b   : > { %v326_v9 = vld [vmem:[%s3965_s24 + $0x238] sm:$0xff]  ;;  %v3545_v17 = vld [vmem:[%s4770_s1 + $0x340] ss:$8 sps:$4 sm:$0xff]  }
  0x2c   : > { %1644 = vmatpush1.bf16.msra.mxu1 %v3474_v34  ;;  %v285_v34 = vld [vmem:[%s3965_s24 + $0xf0] sm:$0xff]  ;;  %v486_v19 = vmax.f32 %v326_v9, 0.0  ;;  %v3569_v9 = vld [vmem:[%s4770_s1 + $0x380] ss:$8 sps:$4 sm:$0xff]  }
  0x2d   : > { %1870 = vmatpush1.bf16.msra.mxu0 %v3475_v35  ;;  %1645 = vmatprep.subr.bf16.mxu1 %v3476_v36  ;;  %v279_v35 = vld [vmem:[%s3965_s24 + $0xc0] sm:$0xff]  ;;  %v289_v36 = vld [vmem:[%s3965_s24 + $0x110] sm:$0xff] }
  0x2e   : > { %1871 = vmatprep.subr.bf16.mxu0 %v3478_v37  ;;  %v3529_v37 = vld [vmem:[%s4770_s1 + $0x314] ss:$8 sps:$4 sm:$0xff]   ;;  %v3536_v12 = vld [vmem:[%s4770_s1 + $0x130] ss:$8 sps:$4 sm:$0xff]  }
  0x2f   : > { %v3539_v13 = vld [vmem:[%s4770_s1 + $0x330] ss:$8 sps:$4 sm:$0xff]  }
  0x30   : > { %1646 = vmatpush1.bf16.msra.mxu1 %v3480_v38  ;;  %v586_v38 = vpack.c.bf16 %v446_v27, %v436_v26  ;;  %v325_v26 = vld [vmem:[%s3965_s24 + $0x230] sm:$0xff]  ;;  %v319_v27 = vld [vmem:[%s3965_s24 + $0x200] sm:$0xff] }
  0x31   : > { %1872 = vmatpush1.bf16.msra.mxu0 %v3481_v39  ;;  %1647 = vmatprep.subr.bf16.mxu1 %v3482_v40  ;;  %v590_v39 = vpack.c.bf16 %v450_v29, %v440_v28  ;;  %v435_v40 = vmax.f32 %v275_v30, 0.0  ;;  %v329_v28 = vld [vmem:[%s3965_s24 + $0x250] sm:$0xff] }
  0x32   : > { %1873 = vmatprep.subr.bf16.mxu0 %v3484_v41  ;;  %v296_v41 = vld [vmem:[%s3965_s24 + $0x148] sm:$0xff]  ;;  %v3553_v29 = vld [vmem:[%s4770_s1 + $0x354] ss:$8 sps:$4 sm:$0xff]  }
  0x33   : > { %v456_v54 = vmax.f32 %v296_v41, 0.0  ;;  %v3551_v41 = vld [vmem:[%s4770_s1 + $0x350] ss:$8 sps:$4 sm:$0xff]  }
  0x34   : > { %1648 = vmatpush1.bf16.msra.mxu1 %v3486_v42  ;;  %v445_v42 = vmax.f32 %v285_v34, 0.0  ;;  %v485_v34 = vmax.f32 %v325_v26, 0.0 }
  0x35   : > { %1874 = vmatpush1.bf16.msra.mxu0 %v3487_v43  ;;  %1649 = vmatprep.subr.bf16.mxu1 %v3488_v44  ;;  %v439_v43 = vmax.f32 %v279_v35, 0.0  ;;  %v449_v44 = vmax.f32 %v289_v36, 0.0  ;;  %v479_v35 = vmax.f32 %v319_v27, 0.0  ;;  %v489_v36 = vmax.f32 %v329_v28, 0.0 }
  0x36   : > { %1875 = vmatprep.subr.bf16.mxu0 %v3490_v45  ;;  %v306_v45 = vld [vmem:[%s3965_s24 + $0x198] sm:$0xff]  ;;  %v585_v59 = vpack.c.bf16 %v445_v42, %v435_v40  ;;  %v3556_v42 = vld [vmem:[%s4770_s1 + $0x164] ss:$8 sps:$4 sm:$0xff]  }
  0x37   : > { %v466_v55 = vmax.f32 %v306_v45, 0.0  ;;  %v3548_v40 = vld [vmem:[%s4770_s1 + $0x150] ss:$8 sps:$4 sm:$0xff]   ;;  %v3557_v45 = vld [vmem:[%s4770_s1 + $0x360] ss:$8 sps:$4 sm:$0xff]  }
  0x38   : > { %1650 = vmatpush1.bf16.msra.mxu1 %v3492_v46  ;;  %v300_v46 = vld [vmem:[%s3965_s24 + $0x168] sm:$0xff] }
  0x39   : > { %1876 = vmatpush1.bf16.msra.mxu0 %v3493_v52  ;;  %1651 = vmatprep.subr.bf16.mxu1 %v3494_v56  ;;  %v3530_v52 = vld [vmem:[%s4770_s1 + $0x120] ss:$8 sps:$4 sm:$0xff]   ;;  %v460_v56 = vmax.f32 %v300_v46, 0.0 }
  0x3a   : > { %1877 = vmatprep.subr.bf16.mxu0 %v3496_v57  ;;  %v470_v57 = vmax.f32 %v310_v47, 0.0 }
  0x3c   : > { %1652 = vmatpush1.bf16.msra.mxu1 %v3498_v60  ;;  %v589_v60 = vpack.c.bf16 %v449_v44, %v439_v43  ;;  %v3559_v43 = vld [vmem:[%s4770_s1 + $0x364] ss:$8 sps:$4 sm:$0xff]   ;;  %v3554_v44 = vld [vmem:[%s4770_s1 + $0x160] ss:$8 sps:$4 sm:$0xff]  }
  0x3d   : > { %1878 = vmatpush1.bf16.msra.mxu0 %v3499_v61  ;;  %1653 = vmatprep.subr.bf16.mxu1 %v3500_v62  ;;  %v3538_v61 = vld [vmem:[%s4770_s1 + $0x134] ss:$8 sps:$4 sm:$0xff]  }
  0x3e   : > { %1879 = vmatprep.subr.bf16.mxu0 %v3502_v63  ;;  %v305_v62 = vld [vmem:[%s3965_s24 + $0x190] sm:$0xff]  ;;  %v299_v63 = vld [vmem:[%s3965_s24 + $0x160] sm:$0xff] }
  0x3f   : > { %v465_v6 = vmax.f32 %v305_v62, 0.0 }
  0x40   : > { %1654 = vmatpush1.bf16.msra.mxu1 %v3504_v0  ;;  %v309_v0 = vld [vmem:[%s3965_s24 + $0x1b0] sm:$0xff] }
  0x41   : > { %1880 = vmatpush1.bf16.msra.mxu0 %v3505_v1  ;;  %1655 = vmatprep.subr.bf16.mxu1 %v3506_v2  ;;  %v3541_v1 = vld [vmem:[%s4770_s1 + $0x334] ss:$8 sps:$4 sm:$0xff]   ;;  %v596_v2 = vpack.c.bf16 %v466_v55, %v456_v54  ;;  %v469_v8 = vmax.f32 %v309_v0, 0.0  ;;  %v339_v55 = vld [vmem:[%s3965_s24 + $0x2a0] sm:$0xff] }
  0x42   : > { %1881 = vmatprep.subr.bf16.mxu0 %v3508_v3  ;;  %v600_v3 = vpack.c.bf16 %v470_v57, %v460_v56  ;;  %v345_v54 = vld [vmem:[%s3965_s24 + $0x2d0] sm:$0xff] }
  0x43   : > { %v349_v56 = vld [vmem:[%s3965_s24 + $0x2f0] sm:$0xff]  ;;  %v505_v62 = vmax.f32 %v345_v54, 0.0 }
  0x44   : > { %1656 = vmatpush1.bf16.msra.mxu1 %v3510_v4  ;;  %v455_v4 = vmax.f32 %v295_v58, 0.0  ;;  %v3565_v57 = vld [vmem:[%s4770_s1 + $0x374] ss:$8 sps:$4 sm:$0xff]   ;;  %v509_v0 = vmax.f32 %v349_v56, 0.0 }
  0x45   : > { %1882 = vmatpush1.bf16.msra.mxu0 %v3511_v5  ;;  %1657 = vmatprep.subr.bf16.mxu1 %v3512_v7  ;;  %v316_v5 = vld [vmem:[%s3965_s24 + $0x1e8] sm:$0xff]  ;;  %v459_v7 = vmax.f32 %v299_v63, 0.0  ;;  %v499_v63 = vmax.f32 %v339_v55, 0.0 }
  0x46   : > { %1883 = vmatprep.subr.bf16.mxu0 %v3514_v11  ;;  %v330_v11 = vld [vmem:[%s3965_s24 + $0x258] sm:$0xff]  ;;  %v476_v18 = vmax.f32 %v316_v5, 0.0 }
  0x47   : > { %v3563_v5 = vld [vmem:[%s4770_s1 + $0x370] ss:$8 sps:$4 sm:$0xff]  }
  0x48   : > { %1658 = vmatpush1.bf16.msra.mxu1 %v3516_v20  ;;  %v480_v20 = vmax.f32 %v320_v10, 0.0  ;;  %v606_v30 = vpack.c.bf16 %v486_v19, %v476_v18  ;;  %v365_v18 = vld [vmem:[%s3965_s24 + $0x370] sm:$0xff]  ;;  %v359_v19 = vld [vmem:[%s3965_s24 + $0x340] sm:$0xff] }
  0x49   : > { %1884 = vmatpush1.bf16.msra.mxu0 %v3517_v21  ;;  %1740 = vmatprep.subr.bf16.mxu1 %v3520_v22  ;;  %v490_v21 = vmax.f32 %v330_v11, 0.0  ;;  %v315_v22 = vld [vmem:[%s3965_s24 + $0x1e0] sm:$0xff]  ;;  %v525_v26 = vmax.f32 %v365_v18, 0.0  ;;  %v519_v27 = vmax.f32 %v359_v19, 0.0  ;;  %v268_v18 = vld [vmem:[%s3965_s24 + $0x68] sm:$0xff]  ;;  %v262_v19 = vld [vmem:[%s3965_s24 + $0x38] sm:$0xff] }
  0x4a   : > { %1966 = vmatprep.subr.bf16.mxu0 %v3523_v23  ;;  %v595_v23 = vpack.c.bf16 %v465_v6, %v455_v4  ;;  %v3560_v4 = vld [vmem:[%s4770_s1 + $0x170] ss:$8 sps:$4 sm:$0xff]   ;;  %v3568_v6 = vld [vmem:[%s4770_s1 + $0x184] ss:$8 sps:$4 sm:$0xff]  }
  0x4b   : > { %1660 = vmatmul.mubr.bf16.vlgmr.msra.gmra.mrb[0].mxu1 %v575_v31  ;;  %v610_v31 = vpack.c.bf16 %v490_v21, %v480_v20  ;;  %v369_v20 = vld [vmem:[%s3965_s24 + $0x390] sm:$0xff] }
  0x4c   : > { %1886 = vmatmul.mubr.bf16.vlgmr.msra.gmra.mrb[0].mxu0 %v579_v32  ;;  %1741 = vmatpush1.bf16.msra.mxu1 %v3518_v24  ;;  %v599_v24 = vpack.c.bf16 %v469_v8, %v459_v7  ;;  %v475_v32 = vmax.f32 %v315_v22, 0.0  ;;  %v3571_v7 = vld [vmem:[%s4770_s1 + $0x384] ss:$8 sps:$4 sm:$0xff]   ;;  %v3566_v8 = vld [vmem:[%s4770_s1 + $0x180] ss:$8 sps:$4 sm:$0xff]   ;;  %v529_v28 = vmax.f32 %v369_v20, 0.0 }
  0x4d   : > { %1967 = vmatpush1.bf16.msra.mxu0 %v3521_v25  ;;  %1742 = vmatprep.subr.bf16.mxu1 %v3526_v33  ;;  %v3550_v25 = vld [vmem:[%s4770_s1 + $0x154] ss:$8 sps:$4 sm:$0xff]   ;;  %v336_v33 = vld [vmem:[%s3965_s24 + $0x288] sm:$0xff] }
  0x4e   : > { %1968 = vmatprep.subr.bf16.mxu0 %v3529_v37  ;;  %1669 = vmatprep.mubr.bf16.mxu1 %v586_v38  ;;  %v346_v37 = vld [vmem:[%s3965_s24 + $0x2d8] sm:$0xff]  ;;  %v340_v38 = vld [vmem:[%s3965_s24 + $0x2a8] sm:$0xff]  ;;  %v496_v46 = vmax.f32 %v336_v33, 0.0 }
  0x4f   : > { %1895 = vmatprep.mubr.bf16.mxu0 %v590_v39  ;;  %v350_v39 = vld [vmem:[%s3965_s24 + $0x2f8] sm:$0xff]  ;;  %v506_v47 = vmax.f32 %v346_v37, 0.0  ;;  %v3581_v37 = vld [vmem:[%s4770_s1 + $0x3a0] ss:$8 sps:$4 sm:$0xff]  }
  0x50   : > { %1743 = vmatpush1.bf16.msra.mxu1 %v3524_v48  ;;  %v500_v48 = vmax.f32 %v340_v38, 0.0  ;;  %v3577_v21 = vld [vmem:[%s4770_s1 + $0x394] ss:$8 sps:$4 sm:$0xff]   ;;  %v3575_v33 = vld [vmem:[%s4770_s1 + $0x390] ss:$8 sps:$4 sm:$0xff]  }
  0x51   : > { %1969 = vmatpush1.bf16.msra.mxu0 %v3527_v49  ;;  %1744 = vmatprep.subr.bf16.mxu1 %v3532_v50  ;;  %v510_v49 = vmax.f32 %v350_v39, 0.0  ;;  %v335_v50 = vld [vmem:[%s3965_s24 + $0x280] sm:$0xff]  ;;  %v616_v58 = vpack.c.bf16 %v506_v47, %v496_v46  ;;  %v385_v46 = vld [vmem:[%s3965_s24 + $0x410] sm:$0xff] }
  0x52   : > { %1970 = vmatprep.subr.bf16.mxu0 %v3535_v51  ;;  %v605_v51 = vpack.c.bf16 %v485_v34, %v475_v32  ;;  %v3572_v32 = vld [vmem:[%s4770_s1 + $0x190] ss:$8 sps:$4 sm:$0xff]   ;;  %v3580_v34 = vld [vmem:[%s4770_s1 + $0x1a4] ss:$8 sps:$4 sm:$0xff]   ;;  %v545_v54 = vmax.f32 %v385_v46, 0.0 }
  0x53   : > { %1670 = vmatmul.mubr.bf16.gmra.mrb[4].mxu1 %v585_v59  ;;  %v620_v59 = vpack.c.bf16 %v510_v49, %v500_v48  ;;  %v379_v47 = vld [vmem:[%s3965_s24 + $0x3e0] sm:$0xff]  ;;  %v389_v48 = vld [vmem:[%s3965_s24 + $0x430] sm:$0xff]  ;;  %v282_v46 = vld [vmem:[%s3965_s24 + $0xd8] sm:$0xff] }
  0x54   : > { %1896 = vmatmul.mubr.bf16.gmra.mrb[4].mxu0 %v589_v60  ;;  %1745 = vmatpush1.bf16.msra.mxu1 %v3530_v52  ;;  %v609_v52 = vpack.c.bf16 %v489_v36, %v479_v35  ;;  %v495_v60 = vmax.f32 %v335_v50, 0.0  ;;  %v3583_v35 = vld [vmem:[%s4770_s1 + $0x3a4] ss:$8 sps:$4 sm:$0xff]   ;;  %v3578_v36 = vld [vmem:[%s4770_s1 + $0x1a0] ss:$8 sps:$4 sm:$0xff]   ;;  %v539_v55 = vmax.f32 %v379_v47, 0.0 }
  0x55   : > { %1971 = vmatpush1.bf16.msra.mxu0 %v3533_v53  ;;  %1746 = vmatprep.subr.bf16.mxu1 %v3538_v61  ;;  %v3562_v53 = vld [vmem:[%s4770_s1 + $0x174] ss:$8 sps:$4 sm:$0xff]   ;;  %v356_v61 = vld [vmem:[%s3965_s24 + $0x328] sm:$0xff]  ;;  %v549_v56 = vmax.f32 %v389_v48, 0.0 }
  0x56   : > { %1972 = vmatprep.subr.bf16.mxu0 %v3541_v1  ;;  %1679 = vmatprep.mubr.bf16.mxu1 %v596_v2  ;;  %v366_v1 = vld [vmem:[%s3965_s24 + $0x378] sm:$0xff]  ;;  %v360_v2 = vld [vmem:[%s3965_s24 + $0x348] sm:$0xff]  ;;  %v516_v10 = vmax.f32 %v356_v61, 0.0 }
  0x57   : > { %1905 = vmatprep.mubr.bf16.mxu0 %v600_v3  ;;  %v370_v3 = vld [vmem:[%s3965_s24 + $0x398] sm:$0xff]  ;;  %v526_v11 = vmax.f32 %v366_v1, 0.0  ;;  %v292_v47 = vld [vmem:[%s3965_s24 + $0x128] sm:$0xff] }
  0x58   : > { %1747 = vmatpush1.bf16.msra.mxu1 %v3536_v12  ;;  %v520_v12 = vmax.f32 %v360_v2, 0.0  ;;  %v3589_v49 = vld [vmem:[%s4770_s1 + $0x3b4] ss:$8 sps:$4 sm:$0xff]   ;;  %v3587_v61 = vld [vmem:[%s4770_s1 + $0x3b0] ss:$8 sps:$4 sm:$0xff]  }
  0x59   : > { %1973 = vmatpush1.bf16.msra.mxu0 %v3539_v13  ;;  %1748 = vmatprep.subr.bf16.mxu1 %v3544_v14  ;;  %v530_v13 = vmax.f32 %v370_v3, 0.0  ;;  %v355_v14 = vld [vmem:[%s3965_s24 + $0x320] sm:$0xff]  ;;  %v626_v22 = vpack.c.bf16 %v526_v11, %v516_v10  ;;  %v409_v11 = vld [vmem:[%s3965_s24 + $0x4d0] sm:$0xff] }
  0x5a   : > { %1974 = vmatprep.subr.bf16.mxu0 %v3547_v15  ;;  %v615_v15 = vpack.c.bf16 %v505_v62, %v495_v60  ;;  %v3584_v60 = vld [vmem:[%s4770_s1 + $0x1b0] ss:$8 sps:$4 sm:$0xff]   ;;  %v3592_v62 = vld [vmem:[%s4770_s1 + $0x1c4] ss:$8 sps:$4 sm:$0xff]  }
  0x5b   : > { %1680 = vmatmul.mubr.bf16.gmra.mrb[8].mxu1 %v595_v23  ;;  %v630_v23 = vpack.c.bf16 %v530_v13, %v520_v12  ;;  %v399_v10 = vld [vmem:[%s3965_s24 + $0x480] sm:$0xff]  ;;  %v3598_v12 = vld [vmem:[%s4770_s1 + $0x1d4] ss:$8 sps:$4 sm:$0xff]  }
  0x5c   : > { %1906 = vmatmul.mubr.bf16.gmra.mrb[8].mxu0 %v599_v24  ;;  %1749 = vmatpush1.bf16.msra.mxu1 %v3542_v16  ;;  %v619_v16 = vpack.c.bf16 %v509_v0, %v499_v63  ;;  %v515_v24 = vmax.f32 %v355_v14, 0.0  ;;  %v3595_v63 = vld [vmem:[%s4770_s1 + $0x3c4] ss:$8 sps:$4 sm:$0xff]   ;;  %v3590_v0 = vld [vmem:[%s4770_s1 + $0x1c0] ss:$8 sps:$4 sm:$0xff]   ;;  %v258_v14 = vld [vmem:[%s3965_s24 + $0x18] sm:$0xff] }
  0x5d   : > { %1975 = vmatpush1.bf16.msra.mxu0 %v3545_v17  ;;  %1750 = vmatprep.subr.bf16.mxu1 %v3550_v25  ;;  %v3574_v17 = vld [vmem:[%s4770_s1 + $0x194] ss:$8 sps:$4 sm:$0xff]   ;;  %v376_v25 = vld [vmem:[%s3965_s24 + $0x3c8] sm:$0xff] }
  0x5e   : > { %1976 = vmatprep.subr.bf16.mxu0 %v3553_v29  ;;  %1689 = vmatprep.mubr.bf16.mxu1 %v606_v30  ;;  %v386_v29 = vld [vmem:[%s3965_s24 + $0x418] sm:$0xff]  ;;  %v380_v30 = vld [vmem:[%s3965_s24 + $0x3e8] sm:$0xff]  ;;  %v536_v38 = vmax.f32 %v376_v25, 0.0 }
  0x5f   : > { %1915 = vmatprep.mubr.bf16.mxu0 %v610_v31  ;;  %v390_v31 = vld [vmem:[%s3965_s24 + $0x438] sm:$0xff]  ;;  %v546_v39 = vmax.f32 %v386_v29, 0.0  ;;  %v3605_v29 = vld [vmem:[%s4770_s1 + $0x3e0] ss:$8 sps:$4 sm:$0xff]  }
  0x60   : > { %1751 = vmatpush1.bf16.msra.mxu1 %v3548_v40  ;;  %v540_v40 = vmax.f32 %v380_v30, 0.0  ;;  %v3601_v13 = vld [vmem:[%s4770_s1 + $0x3d4] ss:$8 sps:$4 sm:$0xff]   ;;  %v3599_v25 = vld [vmem:[%s4770_s1 + $0x3d0] ss:$8 sps:$4 sm:$0xff]   ;;  %v418_v30 = vmax.f32 %v258_v14, 0.0 }
  0x61   : > { %1977 = vmatpush1.bf16.msra.mxu0 %v3551_v41  ;;  %1752 = vmatprep.subr.bf16.mxu1 %v3556_v42  ;;  %v550_v41 = vmax.f32 %v390_v31, 0.0  ;;  %v375_v42 = vld [vmem:[%s3965_s24 + $0x3c0] sm:$0xff]  ;;  %v636_v50 = vpack.c.bf16 %v546_v39, %v536_v38  ;;  %v428_v31 = vmax.f32 %v268_v18, 0.0  ;;  %v3613_v38 = vld [vmem:[%s4770_s1 + $0x3f4] ss:$8 sps:$4 sm:$0xff]  }
  0x62   : > { %1978 = vmatprep.subr.bf16.mxu0 %v3559_v43  ;;  %v625_v43 = vpack.c.bf16 %v525_v26, %v515_v24  ;;  %v3596_v24 = vld [vmem:[%s4770_s1 + $0x1d0] ss:$8 sps:$4 sm:$0xff]   ;;  %v3604_v26 = vld [vmem:[%s4770_s1 + $0x1e4] ss:$8 sps:$4 sm:$0xff]  }
  0x63   : > { %1690 = vmatmul.mubr.bf16.gmra.mrb[12].mxu1 %v605_v51  ;;  %v640_v51 = vpack.c.bf16 %v550_v41, %v540_v40  ;;  %v267_v39 = vld [vmem:[%s3965_s24 + $0x60] sm:$0xff]  ;;  %v261_v40 = vld [vmem:[%s3965_s24 + $0x30] sm:$0xff] }
  0x64   : > { %1916 = vmatmul.mubr.bf16.gmra.mrb[12].mxu0 %v609_v52  ;;  %1753 = vmatpush1.bf16.msra.mxu1 %v3554_v44  ;;  %v629_v44 = vpack.c.bf16 %v529_v28, %v519_v27  ;;  %v535_v52 = vmax.f32 %v375_v42, 0.0  ;;  %v3607_v27 = vld [vmem:[%s4770_s1 + $0x3e4] ss:$8 sps:$4 sm:$0xff]   ;;  %v3602_v28 = vld [vmem:[%s4770_s1 + $0x1e0] ss:$8 sps:$4 sm:$0xff]   ;;  %v278_v42 = vld [vmem:[%s3965_s24 + $0xb8] sm:$0xff] }
  0x65   : > { %1979 = vmatpush1.bf16.msra.mxu0 %v3557_v45  ;;  %1754 = vmatprep.subr.bf16.mxu1 %v3562_v53  ;;  %v3586_v45 = vld [vmem:[%s4770_s1 + $0x1b4] ss:$8 sps:$4 sm:$0xff]   ;;  %v396_v53 = vld [vmem:[%s3965_s24 + $0x468] sm:$0xff]  ;;  %v271_v41 = vld [vmem:[%s3965_s24 + $0x80] sm:$0xff] }
  0x66   : > { %1980 = vmatprep.subr.bf16.mxu0 %v3565_v57  ;;  %1699 = vmatprep.mubr.bf16.mxu1 %v616_v58  ;;  %v406_v57 = vld [vmem:[%s3965_s24 + $0x4b8] sm:$0xff]  ;;  %v400_v58 = vld [vmem:[%s3965_s24 + $0x488] sm:$0xff]  ;;  %v556_v1 = vmax.f32 %v396_v53, 0.0 }
  0x67   : > { %1925 = vmatprep.mubr.bf16.mxu0 %v620_v59  ;;  %v410_v59 = vld [vmem:[%s3965_s24 + $0x4d8] sm:$0xff]  ;;  %v566_v2 = vmax.f32 %v406_v57, 0.0  ;;  %v560_v3 = vmax.f32 %v400_v58, 0.0  ;;  %v442_v57 = vmax.f32 %v282_v46, 0.0  ;;  %v452_v58 = vmax.f32 %v292_v47, 0.0  ;;  %v317_v46 = vld [vmem:[%s3965_s24 + $0x1f0] sm:$0xff] }
  0x68   : > { %1755 = vmatpush1.bf16.msra.mxu1 %v3560_v4  ;;  %v570_v4 = vmax.f32 %v410_v59, 0.0  ;;  %v3611_v53 = vld [vmem:[%s4770_s1 + $0x3f0] ss:$8 sps:$4 sm:$0xff]  }
  0x69   : > { %1981 = vmatpush1.bf16.msra.mxu0 %v3563_v5  ;;  %1756 = vmatprep.subr.bf16.mxu1 %v3568_v6  ;;  %v635_v5 = vpack.c.bf16 %v545_v54, %v535_v52  ;;  %v639_v6 = vpack.c.bf16 %v549_v56, %v539_v55  ;;  %v3608_v52 = vld [vmem:[%s4770_s1 + $0x1f0] ss:$8 sps:$4 sm:$0xff]   ;;  %v438_v54 = vmax.f32 %v278_v42, 0.0  ;;  %v3616_v56 = vld [vmem:[%s4770_s1 + $0x404] ss:$8 sps:$4 sm:$0xff]  }
  0x6a   : > { %1982 = vmatprep.subr.bf16.mxu0 %v3571_v7  ;;  %v3593_v7 = vld [vmem:[%s4770_s1 + $0x3c0] ss:$8 sps:$4 sm:$0xff]  }
  0x6b   : > { %1700 = vmatmul.mubr.bf16.gmra.mrb[16].mxu1 %v615_v15  ;;  %v646_v15 = vpack.c.bf16 %v566_v2, %v556_v1  ;;  %v281_v1 = vld [vmem:[%s3965_s24 + $0xd0] sm:$0xff]  ;;  %v291_v2 = vld [vmem:[%s3965_s24 + $0x120] sm:$0xff] }
  0x6c   : > { %1926 = vmatmul.mubr.bf16.gmra.mrb[16].mxu0 %v619_v16  ;;  %1757 = vmatpush1.bf16.msra.mxu1 %v3566_v8  ;;  %v395_v8 = vld [vmem:[%s3965_s24 + $0x460] sm:$0xff]  ;;  %v650_v16 = vpack.c.bf16 %v570_v4, %v560_v3  ;;  %v3619_v3 = vld [vmem:[%s4770_s1 + $0x414] ss:$8 sps:$4 sm:$0xff]   ;;  %v592_v4 = vpack.c.bf16 %v452_v58, %v442_v57  ;;  %v477_v57 = vmax.f32 %v317_v46, 0.0 }
  0x6d   : > { %1983 = vmatpush1.bf16.msra.mxu0 %v3569_v9  ;;  %1758 = vmatprep.subr.bf16.mxu1 %v3574_v17  ;;  %v405_v9 = vld [vmem:[%s3965_s24 + $0x4b0] sm:$0xff]  ;;  %v555_v17 = vmax.f32 %v395_v8, 0.0  ;;  %v312_v8 = vld [vmem:[%s3965_s24 + $0x1c8] sm:$0xff] }
  0x6e   : > { %1984 = vmatprep.subr.bf16.mxu0 %v3577_v21  ;;  %1709 = vmatprep.mubr.bf16.mxu1 %v626_v22  ;;  %v565_v20 = vmax.f32 %v405_v9, 0.0  ;;  %v559_v21 = vmax.f32 %v399_v10, 0.0  ;;  %v569_v22 = vmax.f32 %v409_v11, 0.0  ;;  %v441_v11 = vmax.f32 %v281_v1, 0.0 }
  0x6f   : > { %1935 = vmatprep.mubr.bf16.mxu0 %v630_v23  ;;  %v272_v23 = vld [vmem:[%s3965_s24 + $0x88] sm:$0xff]  ;;  %v472_v18 = vmax.f32 %v312_v8, 0.0  ;;  %v351_v8 = vld [vmem:[%s3965_s24 + $0x300] sm:$0xff] }
  0x70   : > { %1759 = vmatpush1.bf16.msra.mxu1 %v3572_v32  ;;  %v422_v32 = vmax.f32 %v262_v19, 0.0  ;;  %v3620_v19 = vld [vmem:[%s4770_s1 + $0x420] ss:$8 sps:$4 sm:$0xff]  }
  0x71   : > { %1985 = vmatpush1.bf16.msra.mxu0 %v3575_v33  ;;  %1760 = vmatprep.subr.bf16.mxu1 %v3580_v34  ;;  %v432_v33 = vmax.f32 %v272_v23, 0.0  ;;  %v257_v34 = vld [vmem:[%s3965_s24 + $0x10] sm:$0xff] }
  0x72   : > { %1986 = vmatprep.subr.bf16.mxu0 %v3583_v35  ;;  %v645_v35 = vpack.c.bf16 %v565_v20, %v555_v17  ;;  %v417_v48 = vmax.f32 %v257_v34, 0.0  ;;  %v297_v20 = vld [vmem:[%s3965_s24 + $0x150] sm:$0xff] }
  0x73   : > { %1710 = vmatmul.mubr.bf16.gmra.mrb[20].mxu1 %v625_v43  ;;  %v288_v43 = vld [vmem:[%s3965_s24 + $0x108] sm:$0xff]  ;;  %v3625_v23 = vld [vmem:[%s4770_s1 + $0x434] ss:$8 sps:$4 sm:$0xff]  }
  0x74   : > { %1936 = vmatmul.mubr.bf16.gmra.mrb[20].mxu0 %v629_v44  ;;  %1761 = vmatpush1.bf16.msra.mxu1 %v3578_v36  ;;  %v649_v36 = vpack.c.bf16 %v569_v22, %v559_v21  ;;  %v578_v44 = vpack.c.bf16 %v428_v31, %v418_v30  ;;  %v448_v55 = vmax.f32 %v288_v43, 0.0  ;;  %v328_v30 = vld [vmem:[%s3965_s24 + $0x248] sm:$0xff]  ;;  %v322_v31 = vld [vmem:[%s3965_s24 + $0x218] sm:$0xff] }
  0x75   : > { %1987 = vmatpush1.bf16.msra.mxu0 %v3581_v37  ;;  %1762 = vmatprep.subr.bf16.mxu1 %v3586_v45  ;;  %v3610_v37 = vld [vmem:[%s4770_s1 + $0x1f4] ss:$8 sps:$4 sm:$0xff]   ;;  %v582_v45 = vpack.c.bf16 %v432_v33, %v422_v32  ;;  %v332_v32 = vld [vmem:[%s3965_s24 + $0x268] sm:$0xff]  ;;  %v457_v33 = vmax.f32 %v297_v20, 0.0 }
  0x76   : > { %1988 = vmatprep.subr.bf16.mxu0 %v3589_v49  ;;  %1719 = vmatprep.mubr.bf16.mxu1 %v636_v50  ;;  %v427_v49 = vmax.f32 %v267_v39, 0.0  ;;  %v421_v50 = vmax.f32 %v261_v40, 0.0  ;;  %v488_v39 = vmax.f32 %v328_v30, 0.0  ;;  %v3628_v40 = vld [vmem:[%s4770_s1 + $0x444] ss:$8 sps:$4 sm:$0xff]   ;;  %v492_v42 = vmax.f32 %v332_v32, 0.0 }
  0x77   : > { %1945 = vmatprep.mubr.bf16.mxu0 %v640_v51  ;;  %v431_v51 = vmax.f32 %v271_v41, 0.0  ;;  %v482_v41 = vmax.f32 %v322_v31, 0.0  ;;  %v371_v30 = vld [vmem:[%s3965_s24 + $0x3a0] sm:$0xff]  ;;  %v378_v31 = vld [vmem:[%s3965_s24 + $0x3d8] sm:$0xff]  ;;  %v388_v32 = vld [vmem:[%s3965_s24 + $0x428] sm:$0xff] }
  0x78   : > { %1763 = vmatpush1.bf16.msra.mxu1 %v3584_v60  ;;  %v577_v59 = vpack.c.bf16 %v427_v49, %v417_v48  ;;  %v327_v48 = vld [vmem:[%s3965_s24 + $0x240] sm:$0xff]  ;;  %v321_v49 = vld [vmem:[%s3965_s24 + $0x210] sm:$0xff] }
  0x79   : > { %1989 = vmatpush1.bf16.msra.mxu0 %v3587_v61  ;;  %1764 = vmatprep.subr.bf16.mxu1 %v3592_v62  ;;  %v581_v60 = vpack.c.bf16 %v431_v51, %v421_v50  ;;  %v3614_v61 = vld [vmem:[%s4770_s1 + $0x400] ss:$8 sps:$4 sm:$0xff]   ;;  %v277_v62 = vld [vmem:[%s3965_s24 + $0xb0] sm:$0xff]  ;;  %v487_v58 = vmax.f32 %v327_v48, 0.0  ;;  %v531_v48 = vmax.f32 %v371_v30, 0.0 }
  0x7a   : > { %1990 = vmatprep.subr.bf16.mxu0 %v3595_v63  ;;  %v588_v63 = vpack.c.bf16 %v448_v55, %v438_v54  ;;  %v437_v9 = vmax.f32 %v277_v62, 0.0  ;;  %v331_v50 = vld [vmem:[%s3965_s24 + $0x260] sm:$0xff]  ;;  %v3631_v51 = vld [vmem:[%s4770_s1 + $0x454] ss:$8 sps:$4 sm:$0xff]   ;;  %v348_v54 = vld [vmem:[%s3965_s24 + $0x2e8] sm:$0xff] }
  0x7b   : > { %1720 = vmatmul.mubr.bf16.gmra.mrb[24].mxu1 %v635_v5  ;;  %v298_v5 = vld [vmem:[%s3965_s24 + $0x158] sm:$0xff]  ;;  %v3658_v30 = vld [vmem:[%s4770_s1 + $0x4e4] ss:$8 sps:$4 sm:$0xff]  }
  0x7c   : > { %1946 = vmatmul.mubr.bf16.gmra.mrb[24].mxu0 %v639_v6  ;;  %1765 = vmatpush1.bf16.msra.mxu1 %v3590_v0  ;;  %v287_v0 = vld [vmem:[%s3965_s24 + $0x100] sm:$0xff]  ;;  %v308_v6 = vld [vmem:[%s3965_s24 + $0x1a8] sm:$0xff]  ;;  %v458_v14 = vmax.f32 %v298_v5, 0.0  ;;  %v342_v55 = vld [vmem:[%s3965_s24 + $0x2b8] sm:$0xff] }
  0x7d   : > { %1991 = vmatpush1.bf16.msra.mxu0 %v3593_v7  ;;  %1766 = vmatprep.subr.bf16.mxu1 %v3598_v12  ;;  %v302_v7 = vld [vmem:[%s3965_s24 + $0x178] sm:$0xff]  ;;  %v447_v10 = vmax.f32 %v287_v0, 0.0  ;;  %v451_v12 = vmax.f32 %v291_v2, 0.0  ;;  %v3634_v0 = vld [vmem:[%s4770_s1 + $0x464] ss:$8 sps:$4 sm:$0xff]   ;;  %v502_v1 = vmax.f32 %v342_v55, 0.0 }
  0x7e   : > { %1992 = vmatprep.subr.bf16.mxu0 %v3601_v13  ;;  %1729 = vmatprep.mubr.bf16.mxu1 %v646_v15  ;;  %v3617_v13 = vld [vmem:[%s4770_s1 + $0x410] ss:$8 sps:$4 sm:$0xff]   ;;  %v468_v15 = vmax.f32 %v308_v6, 0.0  ;;  %v462_v17 = vmax.f32 %v302_v7, 0.0  ;;  %v607_v6 = vpack.c.bf16 %v487_v58, %v477_v57  ;;  %v3646_v58 = vld [vmem:[%s4770_s1 + $0x4a4] ss:$8 sps:$4 sm:$0xff]  }
  0x7f   : > { %1955 = vmatprep.mubr.bf16.mxu0 %v650_v16  ;;  %v3622_v16 = vld [vmem:[%s4770_s1 + $0x424] ss:$8 sps:$4 sm:$0xff]   ;;  %v587_v21 = vpack.c.bf16 %v447_v10, %v437_v9  ;;  %v591_v22 = vpack.c.bf16 %v451_v12, %v441_v11  ;;  %v341_v5 = vld [vmem:[%s3965_s24 + $0x2b0] sm:$0xff]  ;;  %v358_v9 = vld [vmem:[%s3965_s24 + $0x338] sm:$0xff] }
  0x80   : > { %1767 = vmatpush1.bf16.msra.mxu1 %v3596_v24  ;;  %v307_v24 = vld [vmem:[%s3965_s24 + $0x1a0] sm:$0xff]  ;;  %v368_v10 = vld [vmem:[%s3965_s24 + $0x388] sm:$0xff]  ;;  %v501_v20 = vmax.f32 %v341_v5, 0.0  ;;  %v3641_v57 = vld [vmem:[%s4770_s1 + $0x490] ss:$8 sps:$4 sm:$0xff]  }
  0x81   : > { %1993 = vmatpush1.bf16.msra.mxu0 %v3599_v25  ;;  %1768 = vmatprep.subr.bf16.mxu1 %v3604_v26  ;;  %v301_v25 = vld [vmem:[%s3965_s24 + $0x170] sm:$0xff]  ;;  %v311_v26 = vld [vmem:[%s3965_s24 + $0x1c0] sm:$0xff]  ;;  %v467_v34 = vmax.f32 %v307_v24, 0.0 }
  0x82   : > { %1994 = vmatprep.subr.bf16.mxu0 %v3607_v27  ;;  %v598_v27 = vpack.c.bf16 %v468_v15, %v458_v14  ;;  %v3632_v11 = vld [vmem:[%s4770_s1 + $0x460] ss:$8 sps:$4 sm:$0xff]   ;;  %v3637_v15 = vld [vmem:[%s4770_s1 + $0x474] ss:$8 sps:$4 sm:$0xff]   ;;  %v3640_v24 = vld [vmem:[%s4770_s1 + $0x484] ss:$8 sps:$4 sm:$0xff]  }
  0x83   : > { %1730 = vmatmul.mubr.bf16.gmra.mrb[28].mxu1 %v645_v35  ;;  %v461_v35 = vmax.f32 %v301_v25, 0.0  ;;  %v597_v43 = vpack.c.bf16 %v467_v34, %v457_v33  ;;  %v372_v14 = vld [vmem:[%s3965_s24 + $0x3a8] sm:$0xff]  ;;  %v382_v33 = vld [vmem:[%s3965_s24 + $0x3f8] sm:$0xff] }
  0x84   : > { %1956 = vmatmul.mubr.bf16.gmra.mrb[28].mxu0 %v649_v36  ;;  %1769 = vmatpush1.bf16.msra.mxu1 %v3602_v28  ;;  %v602_v28 = vpack.c.bf16 %v472_v18, %v462_v17  ;;  %v471_v36 = vmax.f32 %v311_v26, 0.0  ;;  %v532_v26 = vmax.f32 %v372_v14, 0.0  ;;  %v392_v34 = vld [vmem:[%s3965_s24 + $0x448] sm:$0xff]  ;;  %v3647_v5 = vld [vmem:[%s4770_s1 + $0x4b0] ss:$8 sps:$4 sm:$0xff]  }
  0x85   : > { %1995 = vmatpush1.bf16.msra.mxu0 %v3605_v29  ;;  %1770 = vmatprep.subr.bf16.mxu1 %v3610_v37  ;;  %v318_v29 = vld [vmem:[%s3965_s24 + $0x1f8] sm:$0xff]  ;;  %v397_v14 = vld [vmem:[%s3965_s24 + $0x470] sm:$0xff] }
  0x86   : > { %1996 = vmatprep.subr.bf16.mxu0 %v3613_v38  ;;  %1772 = vmatprep.mubr.bf16.mxu1 %v578_v44  ;;  %v3623_v37 = vld [vmem:[%s4770_s1 + $0x430] ss:$8 sps:$4 sm:$0xff]   ;;  %v478_v38 = vmax.f32 %v318_v29, 0.0  ;;  %v601_v44 = vpack.c.bf16 %v471_v36, %v461_v35 }
  0x87   : > { %1998 = vmatprep.mubr.bf16.mxu0 %v582_v45  ;;  %v3626_v45 = vld [vmem:[%s4770_s1 + $0x440] ss:$8 sps:$4 sm:$0xff]   ;;  %v361_v29 = vld [vmem:[%s3965_s24 + $0x350] sm:$0xff] }
  0x88   : > { %1771 = vmatpush1.bf16.msra.mxu1 %v3608_v52  ;;  %v608_v47 = vpack.c.bf16 %v488_v39, %v478_v38  ;;  %v612_v52 = vpack.c.bf16 %v492_v42, %v482_v41  ;;  %v377_v35 = vld [vmem:[%s3965_s24 + $0x3d0] sm:$0xff]  ;;  %v3638_v38 = vld [vmem:[%s4770_s1 + $0x480] ss:$8 sps:$4 sm:$0xff]  }
  0x89   : > { %1997 = vmatpush1.bf16.msra.mxu0 %v3611_v53  ;;  %v338_v53 = vld [vmem:[%s3965_s24 + $0x298] sm:$0xff]  ;;  %v387_v41 = vld [vmem:[%s3965_s24 + $0x420] sm:$0xff]  ;;  %v381_v42 = vld [vmem:[%s3965_s24 + $0x3f0] sm:$0xff] }
  0x8a   : > { %2079 = vmatprep.subr.bf16.mxu0 %v3616_v56  ;;  %v352_v56 = vld [vmem:[%s3965_s24 + $0x308] sm:$0xff]  ;;  %v498_v62 = vmax.f32 %v338_v53, 0.0  ;;  %v537_v53 = vmax.f32 %v377_v35, 0.0  ;;  %v541_v55 = vmax.f32 %v381_v42, 0.0  ;;  %v263_v35 = vld [vmem:[%s3965_s24 + $0x40] sm:$0xff] }
  0x8b   : > { %1773 = vmatmul.mubr.bf16.vlgmr.msra.gmra.mrb[0].mxu1 %v577_v59  ;;  %v481_v59 = vmax.f32 %v321_v49, 0.0  ;;  %v512_v2 = vmax.f32 %v352_v56, 0.0  ;;  %v538_v49 = vmax.f32 %v378_v31, 0.0  ;;  %v3659_v42 = vld [vmem:[%s4770_s1 + $0x4f0] ss:$8 sps:$4 sm:$0xff]  }
  0x8c   : > { %1999 = vmatmul.mubr.bf16.vlgmr.msra.gmra.mrb[0].mxu0 %v581_v60  ;;  %1782 = vmatprep.mubr.bf16.mxu1 %v588_v63  ;;  %v491_v60 = vmax.f32 %v331_v50, 0.0  ;;  %v508_v63 = vmax.f32 %v348_v54, 0.0  ;;  %v548_v50 = vmax.f32 %v388_v32, 0.0  ;;  %v547_v54 = vmax.f32 %v387_v41, 0.0 }
  0x8d   : > { %2080 = vmatpush1.bf16.msra.mxu0 %v3614_v61  ;;  %2008 = vmatprep.mubr.bf16.mxu0 %v592_v4  ;;  %v3629_v61 = vld [vmem:[%s4770_s1 + $0x450] ss:$8 sps:$4 sm:$0xff]   ;;  %v347_v4 = vld [vmem:[%s3965_s24 + $0x2e0] sm:$0xff] }
  0x8e   : > { %2081 = vmatprep.subr.bf16.mxu0 %v3619_v3  ;;  %v337_v3 = vld [vmem:[%s3965_s24 + $0x290] sm:$0xff]  ;;  %v611_v7 = vpack.c.bf16 %v491_v60, %v481_v59  ;;  %v618_v12 = vpack.c.bf16 %v508_v63, %v498_v62  ;;  %v507_v18 = vmax.f32 %v347_v4, 0.0  ;;  %v3644_v59 = vld [vmem:[%s4770_s1 + $0x4a0] ss:$8 sps:$4 sm:$0xff]   ;;  %v398_v63 = vld [vmem:[%s3965_s24 + $0x478] sm:$0xff] }
  0x8f   : > { %v497_v17 = vmax.f32 %v337_v3, 0.0  ;;  %v3649_v62 = vld [vmem:[%s4770_s1 + $0x4b4] ss:$8 sps:$4 sm:$0xff]   ;;  %v412_v3 = vld [vmem:[%s3965_s24 + $0x4e8] sm:$0xff] }
  0x91   : > { %2082 = vmatpush1.bf16.msra.mxu0 %v3617_v13  ;;  %v362_v13 = vld [vmem:[%s3965_s24 + $0x358] sm:$0xff]  ;;  %v617_v36 = vpack.c.bf16 %v507_v18, %v497_v17  ;;  %v401_v17 = vld [vmem:[%s3965_s24 + $0x490] sm:$0xff]  ;;  %v411_v18 = vld [vmem:[%s3965_s24 + $0x4e0] sm:$0xff] }
  0x92   : > { %2083 = vmatprep.subr.bf16.mxu0 %v3622_v16  ;;  %v622_v16 = vpack.c.bf16 %v512_v2, %v502_v1  ;;  %v522_v25 = vmax.f32 %v362_v13, 0.0  ;;  %v638_v1 = vpack.c.bf16 %v548_v50, %v538_v49  ;;  %v402_v2 = vld [vmem:[%s3965_s24 + $0x498] sm:$0xff]  ;;  %v3650_v13 = vld [vmem:[%s4770_s1 + $0x4c0] ss:$8 sps:$4 sm:$0xff]  }
  0x93   : > { %1783 = vmatmul.mubr.bf16.gmra.mrb[4].mxu1 %v587_v21  ;;  %v511_v21 = vmax.f32 %v351_v8, 0.0  ;;  %v3652_v8 = vld [vmem:[%s4770_s1 + $0x4c4] ss:$8 sps:$4 sm:$0xff]   ;;  %v314_v50 = vld [vmem:[%s3965_s24 + $0x1d8] sm:$0xff] }
  0x94   : > { %2009 = vmatmul.mubr.bf16.gmra.mrb[4].mxu0 %v591_v22  ;;  %1792 = vmatprep.mubr.bf16.mxu1 %v598_v27  ;;  %v518_v22 = vmax.f32 %v358_v9, 0.0  ;;  %v357_v27 = vld [vmem:[%s3965_s24 + $0x330] sm:$0xff]  ;;  %v562_v9 = vmax.f32 %v402_v2, 0.0  ;;  %v304_v49 = vld [vmem:[%s3965_s24 + $0x188] sm:$0xff] }
  0x95   : > { %2084 = vmatpush1.bf16.msra.mxu0 %v3620_v19  ;;  %2018 = vmatprep.mubr.bf16.mxu0 %v602_v28  ;;  %v3635_v19 = vld [vmem:[%s4770_s1 + $0x470] ss:$8 sps:$4 sm:$0xff]   ;;  %v367_v28 = vld [vmem:[%s3965_s24 + $0x380] sm:$0xff] }
  0x96   : > { %2085 = vmatprep.subr.bf16.mxu0 %v3625_v23  ;;  %v528_v23 = vmax.f32 %v368_v10, 0.0  ;;  %v527_v46 = vmax.f32 %v367_v28, 0.0  ;;  %v572_v10 = vmax.f32 %v412_v3, 0.0  ;;  %v323_v3 = vld [vmem:[%s3965_s24 + $0x220] sm:$0xff] }
  0x98   : > { %v628_v39 = vpack.c.bf16 %v528_v23, %v518_v22  ;;  %v274_v22 = vld [vmem:[%s3965_s24 + $0x98] sm:$0xff]  ;;  %v557_v23 = vmax.f32 %v397_v14, 0.0  ;;  %v353_v14 = vld [vmem:[%s3965_s24 + $0x310] sm:$0xff] }
  0x99   : > { %2086 = vmatpush1.bf16.msra.mxu0 %v3623_v37  ;;  %v621_v37 = vpack.c.bf16 %v511_v21, %v501_v20  ;;  %v652_v20 = vpack.c.bf16 %v572_v10, %v562_v9  ;;  %v264_v21 = vld [vmem:[%s3965_s24 + $0x48] sm:$0xff] }
  0x9a   : > { %2087 = vmatprep.subr.bf16.mxu0 %v3628_v40  ;;  %v517_v40 = vmax.f32 %v357_v27, 0.0  ;;  %v3653_v27 = vld [vmem:[%s4770_s1 + $0x4d0] ss:$8 sps:$4 sm:$0xff]   ;;  %v424_v28 = vmax.f32 %v264_v21, 0.0 }
  0x9b   : > { %1793 = vmatmul.mubr.bf16.gmra.mrb[8].mxu1 %v597_v43  ;;  %v391_v43 = vld [vmem:[%s3965_s24 + $0x440] sm:$0xff] }
  0x9c   : > { %2019 = vmatmul.mubr.bf16.gmra.mrb[8].mxu0 %v601_v44  ;;  %1802 = vmatprep.mubr.bf16.mxu1 %v608_v47  ;;  %v3643_v44 = vld [vmem:[%s4770_s1 + $0x494] ss:$8 sps:$4 sm:$0xff]   ;;  %v521_v47 = vmax.f32 %v361_v29, 0.0  ;;  %v551_v56 = vmax.f32 %v391_v43, 0.0  ;;  %v627_v60 = vpack.c.bf16 %v527_v46, %v517_v40  ;;  %v434_v29 = vmax.f32 %v274_v22, 0.0 }
  0x9d   : > { %2088 = vmatpush1.bf16.msra.mxu0 %v3626_v45  ;;  %2028 = vmatprep.mubr.bf16.mxu0 %v612_v52  ;;  %v632_v45 = vpack.c.bf16 %v532_v26, %v522_v25  ;;  %v552_v52 = vmax.f32 %v392_v34, 0.0  ;;  %v561_v25 = vmax.f32 %v401_v17, 0.0  ;;  %v571_v26 = vmax.f32 %v411_v18, 0.0 }
  0x9e   : > { %2089 = vmatprep.subr.bf16.mxu0 %v3631_v51  ;;  %v542_v51 = vmax.f32 %v382_v33, 0.0  ;;  %v3656_v33 = vld [vmem:[%s4770_s1 + $0x4e0] ss:$8 sps:$4 sm:$0xff]   ;;  %v584_v34 = vpack.c.bf16 %v434_v29, %v424_v28  ;;  %v423_v40 = vmax.f32 %v263_v35, 0.0  ;;  %v513_v18 = vmax.f32 %v353_v14, 0.0 }
  0x9f   : > { %v651_v32 = vpack.c.bf16 %v571_v26, %v561_v25  ;;  %v384_v25 = vld [vmem:[%s3965_s24 + $0x408] sm:$0xff]  ;;  %v394_v26 = vld [vmem:[%s3965_s24 + $0x458] sm:$0xff]  ;;  %v3663_v28 = vld [vmem:[%s4772_s3] sm:$0xff]  }
  0xa0   : > { %v642_v4 = vpack.c.bf16 %v552_v52, %v542_v51  ;;  %v383_v35 = vld [vmem:[%s3965_s24 + $0x400] sm:$0xff] }
  0xa1   : > { %2090 = vmatpush1.bf16.msra.mxu0 %v3629_v61  ;;  %v631_v61 = vpack.c.bf16 %v531_v48, %v521_v47  ;;  %v283_v47 = vld [vmem:[%s3965_s24 + $0xe0] sm:$0xff]  ;;  %v293_v48 = vld [vmem:[%s3965_s24 + $0x130] sm:$0xff] }
  0xa2   : > { %2091 = vmatprep.subr.bf16.mxu0 %v3634_v0  ;;  %v408_v0 = vld [vmem:[%s3965_s24 + $0x4c8] sm:$0xff]  ;;  %v443_v51 = vmax.f32 %v283_v47, 0.0  ;;  %v453_v52 = vmax.f32 %v293_v48, 0.0  ;;  %v403_v47 = vld [vmem:[%s3965_s24 + $0x4a0] sm:$0xff]  ;;  %v413_v48 = vld [vmem:[%s3965_s24 + $0x4f0] sm:$0xff] }
  0xa3   : > { %1803 = vmatmul.mubr.bf16.gmra.mrb[12].mxu1 %v607_v6  ;;  %v558_v6 = vmax.f32 %v398_v63, 0.0 }
  0xa4   : > { %2029 = vmatmul.mubr.bf16.gmra.mrb[12].mxu0 %v611_v7  ;;  %1812 = vmatprep.mubr.bf16.mxu1 %v618_v12  ;;  %v568_v7 = vmax.f32 %v408_v0, 0.0  ;;  %v641_v12 = vpack.c.bf16 %v551_v56, %v541_v55  ;;  %v593_v55 = vpack.c.bf16 %v453_v52, %v443_v51  ;;  %v563_v51 = vmax.f32 %v403_v47, 0.0 }
  0xa5   : > { %2092 = vmatpush1.bf16.msra.mxu0 %v3632_v11  ;;  %2038 = vmatprep.mubr.bf16.mxu0 %v622_v16  ;;  %v637_v11 = vpack.c.bf16 %v547_v54, %v537_v53  ;;  %v407_v16 = vld [vmem:[%s3965_s24 + $0x4c0] sm:$0xff]  ;;  %v464_v53 = vmax.f32 %v304_v49, 0.0  ;;  %v474_v54 = vmax.f32 %v314_v50, 0.0  ;;  %v3666_v49 = vld [vmem:[%s4772_s3 + $0x50] sm:$0xff]   ;;  %v573_v52 = vmax.f32 %v413_v48, 0.0 }
  0xa6   : > { %2093 = vmatprep.subr.bf16.mxu0 %v3637_v15  ;;  %v648_v15 = vpack.c.bf16 %v568_v7, %v558_v6  ;;  %v354_v6 = vld [vmem:[%s3965_s24 + $0x318] sm:$0xff]  ;;  %v483_v7 = vmax.f32 %v323_v3, 0.0  ;;  %v3667_v50 = vld [vmem:[%s4772_s3 + $0x10] sm:$0xff]  }
  0xa7   : > { %v604_v56 = vpack.c.bf16 %v474_v54, %v464_v53  ;;  %v514_v10 = vmax.f32 %v354_v6, 0.0  ;;  %v653_v53 = vpack.c.bf16 %v573_v52, %v563_v51  ;;  %v3668_v54 = vld [vmem:[%s4772_s3 + $0x58] sm:$0xff]  }
  0xa9   : > { %2094 = vmatpush1.bf16.msra.mxu0 %v3635_v19  ;;  %v3655_v19 = vld [vmem:[%s4770_s1 + $0x4d4] ss:$8 sps:$4 sm:$0xff]  }
  0xaa   : > { %2095 = vmatprep.subr.bf16.mxu0 %v3640_v24  ;;  %v567_v24 = vmax.f32 %v407_v16, 0.0  ;;  %v374_v16 = vld [vmem:[%s3965_s24 + $0x3b8] sm:$0xff] }
  0xab   : > { %1813 = vmatmul.mubr.bf16.gmra.mrb[16].mxu1 %v617_v36  ;;  %v273_v36 = vld [vmem:[%s3965_s24 + $0x90] sm:$0xff] }
  0xac   : > { %2039 = vmatmul.mubr.bf16.gmra.mrb[16].mxu0 %v621_v37  ;;  %1822 = vmatprep.mubr.bf16.mxu1 %v628_v39  ;;  %v647_v31 = vpack.c.bf16 %v567_v24, %v557_v23  ;;  %v3661_v37 = vld [vmem:[%s4770_s1 + $0x4f4] ss:$8 sps:$4 sm:$0xff]   ;;  %v433_v41 = vmax.f32 %v273_v36, 0.0  ;;  %v363_v23 = vld [vmem:[%s3965_s24 + $0x360] sm:$0xff] }
  0xad   : > { %2096 = vmatpush1.bf16.msra.mxu0 %v3638_v38  ;;  %2048 = vmatprep.mubr.bf16.mxu0 %v632_v45  ;;  %v284_v38 = vld [vmem:[%s3965_s24 + $0xe8] sm:$0xff]  ;;  %v294_v39 = vld [vmem:[%s3965_s24 + $0x138] sm:$0xff]  ;;  %v373_v24 = vld [vmem:[%s3965_s24 + $0x3b0] sm:$0xff]  ;;  %v523_v29 = vmax.f32 %v363_v23, 0.0 }
  0xae   : > { %2097 = vmatprep.subr.bf16.mxu0 %v3643_v44  ;;  %v444_v43 = vmax.f32 %v284_v38, 0.0  ;;  %v454_v44 = vmax.f32 %v294_v39, 0.0  ;;  %v583_v45 = vpack.c.bf16 %v433_v41, %v423_v40  ;;  %v393_v36 = vld [vmem:[%s3965_s24 + $0x450] sm:$0xff]  ;;  %v414_v38 = vld [vmem:[%s3965_s24 + $0x4f8] sm:$0xff]  ;;  %v3664_v39 = vld [vmem:[%s4772_s3 + $0x48] sm:$0xff]   ;;  %v543_v41 = vmax.f32 %v383_v35, 0.0 }
  0xaf   : > { %v3665_v40 = vld [vmem:[%s4772_s3 + $0x8] sm:$0xff]  }
  0xb0   : > { %v594_v46 = vpack.c.bf16 %v454_v44, %v444_v43  ;;  %v574_v44 = vmax.f32 %v414_v38, 0.0 }
  0xb1   : > { %2098 = vmatpush1.bf16.msra.mxu0 %v3641_v57  ;;  %v303_v57 = vld [vmem:[%s3965_s24 + $0x180] sm:$0xff] }
  0xb2   : > { %2099 = vmatprep.subr.bf16.mxu0 %v3646_v58  ;;  %v313_v58 = vld [vmem:[%s3965_s24 + $0x1d0] sm:$0xff] }
  0xb3   : > { %1823 = vmatmul.mubr.bf16.gmra.mrb[20].mxu1 %v627_v60  ;;  %v334_v60 = vld [vmem:[%s3965_s24 + $0x278] sm:$0xff] }
  0xb4   : > { %2049 = vmatmul.mubr.bf16.gmra.mrb[20].mxu0 %v631_v61  ;;  %1832 = vmatprep.mubr.bf16.mxu1 %v638_v1  ;;  %v463_v61 = vmax.f32 %v303_v57, 0.0  ;;  %v494_v0 = vmax.f32 %v334_v60, 0.0  ;;  %v3671_v57 = vld [vmem:[%s4772_s3 + $0x20] sm:$0xff]   ;;  %v3674_v60 = vld [vmem:[%s4772_s3 + $0x70] sm:$0xff]  }
  0xb5   : > { %2100 = vmatpush1.bf16.msra.mxu0 %v3644_v59  ;;  %2058 = vmatprep.mubr.bf16.mxu0 %v642_v4  ;;  %v324_v59 = vld [vmem:[%s3965_s24 + $0x228] sm:$0xff]  ;;  %v333_v4 = vld [vmem:[%s3965_s24 + $0x270] sm:$0xff] }
  0xb6   : > { %2101 = vmatprep.subr.bf16.mxu0 %v3649_v62  ;;  %v473_v62 = vmax.f32 %v313_v58, 0.0  ;;  %v484_v63 = vmax.f32 %v324_v59, 0.0  ;;  %v3672_v58 = vld [vmem:[%s4772_s3 + $0x68] sm:$0xff]  }
  0xb7   : > { %v3673_v59 = vld [vmem:[%s4772_s3 + $0x28] sm:$0xff]  }
  0xb8   : > { %v603_v1 = vpack.c.bf16 %v473_v62, %v463_v61  ;;  %v614_v2 = vpack.c.bf16 %v494_v0, %v484_v63  ;;  %v3675_v61 = vld [vmem:[%s4772_s3 + $0x30] sm:$0xff]   ;;  %v3676_v62 = vld [vmem:[%s4772_s3 + $0x78] sm:$0xff]  }
  0xb9   : > { %2102 = vmatpush1.bf16.msra.mxu0 %v3647_v5  ;;  %v344_v5 = vld [vmem:[%s3965_s24 + $0x2c8] sm:$0xff]  ;;  %v3677_v63 = vld [vmem:[%s4772_s3 + $0x38] sm:$0xff]  }
  0xba   : > { %2103 = vmatprep.subr.bf16.mxu0 %v3652_v8  ;;  %v493_v8 = vmax.f32 %v333_v4, 0.0  ;;  %v504_v9 = vmax.f32 %v344_v5, 0.0 }
  0xbb   : > { %1833 = vmatmul.mubr.bf16.gmra.mrb[24].mxu1 %v637_v11 }
  0xbc   : > { %2059 = vmatmul.mubr.bf16.gmra.mrb[24].mxu0 %v641_v12  ;;  %1842 = vmatprep.mubr.bf16.mxu1 %v648_v15  ;;  %v613_v11 = vpack.c.bf16 %v493_v8, %v483_v7  ;;  %v624_v12 = vpack.c.bf16 %v514_v10, %v504_v9  ;;  %v364_v15 = vld [vmem:[%s3965_s24 + $0x368] sm:$0xff] }
  0xbd   : > { %2104 = vmatpush1.bf16.msra.mxu0 %v3650_v13  ;;  %2068 = vmatprep.mubr.bf16.mxu0 %v652_v20  ;;  %v343_v13 = vld [vmem:[%s3965_s24 + $0x2c0] sm:$0xff]  ;;  %v534_v20 = vmax.f32 %v374_v16, 0.0 }
  0xbe   : > { %2105 = vmatprep.subr.bf16.mxu0 %v3655_v19  ;;  %v503_v17 = vmax.f32 %v343_v13, 0.0  ;;  %v524_v19 = vmax.f32 %v364_v15, 0.0 }
  0xc0   : > { %v623_v21 = vpack.c.bf16 %v513_v18, %v503_v17  ;;  %v634_v22 = vpack.c.bf16 %v534_v20, %v524_v19 }
  0xc1   : > { %2106 = vmatpush1.bf16.msra.mxu0 %v3653_v27  ;;  %v3662_v27 = vld [vmem:[%s4772_s3 + $0x40] sm:$0xff]  }
  0xc2   : > { %2107 = vmatprep.subr.bf16.mxu0 %v3658_v30  ;;  %v533_v30 = vmax.f32 %v373_v24, 0.0  ;;  %3109 = vmatprep.subr.bf16.mxu1 %v3662_v27  ;;  %v817_v24 = vlaneseq }
  0xc3   : > { %1843 = vmatmul.mubr.bf16.gmra.mrb[28].mxu1 %v647_v31  ;;  %v544_v31 = vmax.f32 %v384_v25, 0.0 }
  0xc4   : > { %2069 = vmatmul.mubr.bf16.gmra.mrb[28].mxu0 %v651_v32  ;;  %v554_v32 = vmax.f32 %v394_v26, 0.0  ;;  %3110 = vmatpush3.bf16.msra.mxu1 %v3663_v28  ;;  %v818_v28 = vshrl.u32 %v817_v24, 7 }
  0xc5   : > { %2108 = vmatpush1.bf16.msra.mxu0 %v3656_v33  ;;  %2111 = vmatprep.mubr.bf16.mxu0 %v584_v34  ;;  %v633_v33 = vpack.c.bf16 %v533_v30, %v523_v29 }
  0xc6   : > { %2109 = vmatprep.subr.bf16.mxu0 %v3661_v37  ;;  %v644_v34 = vpack.c.bf16 %v554_v32, %v544_v31  ;;  %v404_v37 = vld [vmem:[%s3965_s24 + $0x4a8] sm:$0xff]  ;;  %3111 = vmatprep.subr.bf16.mxu1 %v3664_v39  ;;  %v819_v30 = vsub.s32 0, %v818_v28  ;;  %v815_v31 = vld [vmem:[%s4771_s2] sm:$0x3]  ;;  %v823_v32 = vsub.s32 1, %v818_v28 }
  0xc7   : > { %v564_v43 = vmax.f32 %v404_v37, 0.0 }
  0xc8   : > { %3112 = vmatpush3.bf16.msra.mxu1 %v3665_v40  ;;  %v4576_v38 = vrot.slane %v815_v31, %v823_v32 }
  0xc9   : > { %2110 = vmatpush1.bf16.msra.mxu0 %v3659_v42  ;;  %v553_v42 = vmax.f32 %v393_v36, 0.0  ;;  %3113 = vmatprep.subr.bf16.mxu1 %v3666_v49  ;;  %v4572_v36 = vrot.slane %v815_v31, %v819_v30 }
  0xcc   : > { %2112 = vmatmul.mubr.bf16.vlgmr.msra.gmra.mrb[0].mxu0 %v583_v45  ;;  %v643_v45 = vpack.c.bf16 %v553_v42, %v543_v41  ;;  %3114 = vmatpush3.bf16.msra.mxu1 %v3667_v50 }
  0xcd   : > { %2121 = vmatprep.mubr.bf16.mxu0 %v594_v46  ;;  %v654_v46 = vpack.c.bf16 %v574_v44, %v564_v43  ;;  %3115 = vmatprep.subr.bf16.mxu1 %v3668_v54 }
  0xd4   : > { %2122 = vmatmul.mubr.bf16.gmra.mrb[4].mxu0 %v593_v55  ;;  %v3669_v55 = vld [vmem:[%s4772_s3 + $0x18] sm:$0xff]  }
  0xd5   : > { %2131 = vmatprep.mubr.bf16.mxu0 %v604_v56  ;;  %3116 = vmatpush3.bf16.msra.mxu1 %v3669_v55  ;;  %v3670_v56 = vld [vmem:[%s4772_s3 + $0x60] sm:$0xff]  }
  0xd6   : > { %3117 = vmatprep.subr.bf16.mxu1 %v3670_v56 }
  0xd9   : > { %3118 = vmatpush3.bf16.msra.mxu1 %v3671_v57 }
  0xda   : > { %3119 = vmatprep.subr.bf16.mxu1 %v3672_v58 }
  0xdc   : > { %2132 = vmatmul.mubr.bf16.gmra.mrb[8].mxu0 %v603_v1 }
  0xdd   : > { %2141 = vmatprep.mubr.bf16.mxu0 %v614_v2  ;;  %3120 = vmatpush3.bf16.msra.mxu1 %v3673_v59 }
  0xde   : > { %3121 = vmatprep.subr.bf16.mxu1 %v3674_v60 }
  0xe1   : > { %3122 = vmatpush3.bf16.msra.mxu1 %v3675_v61 }
  0xe2   : > { %3123 = vmatprep.subr.bf16.mxu1 %v3676_v62 }
  0xe4   : > { %2142 = vmatmul.mubr.bf16.gmra.mrb[12].mxu0 %v613_v11 }
  0xe5   : > { %2151 = vmatprep.mubr.bf16.mxu0 %v624_v12  ;;  %3124 = vmatpush3.bf16.msra.mxu1 %v3677_v63 }
  0xec   : > { %2152 = vmatmul.mubr.bf16.gmra.mrb[16].mxu0 %v623_v21 }
  0xed   : > { %2161 = vmatprep.mubr.bf16.mxu0 %v634_v22 }
  0xf4   : > { %2162 = vmatmul.mubr.bf16.gmra.mrb[20].mxu0 %v633_v33 }
  0xf5   : > { %2171 = vmatprep.mubr.bf16.mxu0 %v644_v34 }
  0xfc   : > { %2172 = vmatmul.mubr.bf16.gmra.mrb[24].mxu0 %v643_v45 }
  0xfd   : > { %2181 = vmatprep.mubr.bf16.mxu0 %v654_v46 }
 0x104   : > { %2182 = vmatmul.mubr.bf16.gmra.mrb[28].mxu0 %v653_v53 }
 0x15e   : > { %v1774_v0 = vpop.f32.mrb[0].mxu1 }
 0x15f   : > { %v1776_v1 = vpop.f32.mrb[1].mxu1  ;;  %v3173_v39 = vadd.f32 %v1774_v0, %v4572_v36 }
 0x160   : > { %v1778_v2 = vpop.f32.mrb[2].mxu1  ;;  %v3175_v40 = vadd.f32 %v1776_v1, %v4576_v38 }
 0x161   : > { %v1780_v3 = vpop.f32.mrb[3].mxu1  ;;  %v3177_v42 = vadd.f32 %v1778_v2, %v4572_v36 }
 0x162   : > { %v3179_v45 = vadd.f32 %v1780_v3, %v4576_v38 }
 0x166   : > { %v1784_v4 = vpop.f32.mrb[4].mxu1 }
 0x167   : > { %v1786_v5 = vpop.f32.mrb[5].mxu1  ;;  %v3181_v55 = vadd.f32 %v1784_v4, %v4572_v36 }
 0x168   : > { %v1788_v6 = vpop.f32.mrb[6].mxu1  ;;  %v3183_v57 = vadd.f32 %v1786_v5, %v4576_v38 }
 0x169   : > { %v1790_v7 = vpop.f32.mrb[7].mxu1  ;;  %v3185_v60 = vadd.f32 %v1788_v6, %v4572_v36 }
 0x16a   : > { %v3187_v63 = vadd.f32 %v1790_v7, %v4576_v38 }
 0x16e   : > { %v4523_v8 = vpop.f32.mrb[8].mxu1 }
 0x16f   : > { %v4525_v9 = vpop.f32.mrb[9].mxu1  ;;  %v3189_v5 = vadd.f32 %v4523_v8, %v4572_v36 }
 0x170   : > { %v4527_v10 = vpop.f32.mrb[10].mxu1  ;;  %v3191_v6 = vadd.f32 %v4525_v9, %v4576_v38 }
 0x171   : > { %v4529_v11 = vpop.f32.mrb[11].mxu1 }
 0x176   : > { %v4531_v12 = vpop.f32.mrb[12].mxu1 }
 0x177   : > { %v4533_v13 = vpop.f32.mrb[13].mxu1 }
 0x178   : > { %v4535_v14 = vpop.f32.mrb[14].mxu1 }
 0x179   : > { %v4537_v15 = vpop.f32.mrb[15].mxu1 }
 0x17e   : > { %v4539_v16 = vpop.f32.mrb[16].mxu1 }
 0x17f   : > { %v4541_v17 = vpop.f32.mrb[17].mxu1 }
 0x180   : > { %v4543_v18 = vpop.f32.mrb[18].mxu1 }
 0x181   : > { %v4545_v19 = vpop.f32.mrb[19].mxu1 }
 0x186   : > { %v4547_v20 = vpop.f32.mrb[20].mxu1 }
 0x187   : > { %v4549_v21 = vpop.f32.mrb[21].mxu1 }
 0x188   : > { %v4551_v22 = vpop.f32.mrb[22].mxu1 }
 0x189   : > { %v4553_v23 = vpop.f32.mrb[23].mxu1 }
 0x18e   : > { %v4555_v25 = vpop.f32.mrb[24].mxu1 }
 0x18f   : > { %v4557_v26 = vpop.f32.mrb[25].mxu1 }
 0x190   : > { %v4559_v27 = vpop.f32.mrb[26].mxu1 }
 0x191   : > { %v4561_v29 = vpop.f32.mrb[27].mxu1 }
 0x196   : > { %v4566_v33 = vpop.f32.mrb[28].mxu1 }
 0x197   : > { %v4568_v34 = vpop.f32.mrb[29].mxu1 }
 0x198   : > { %v4570_v35 = vpop.f32.mrb[30].mxu1 }
 0x199   : > { %v4574_v37 = vpop.f32.mrb[31].mxu1 }
 0x19f   : > { %v2113_v41 = vpop.f32.mrb[0].mxu0 }
 0x1a0   : > { %v3174_v43 = vadd.f32 %v3173_v39, %v2113_v41  ;;  %v2115_v44 = vpop.f32.mrb[1].mxu0 }
 0x1a1   : > { %v3176_v46 = vadd.f32 %v3175_v40, %v2115_v44  ;;  %v2117_v47 = vpop.f32.mrb[2].mxu0  ;;  %v3193_v40 = vadd.f32 %v4527_v10, %v4572_v36 }
 0x1a2   : > { %v3178_v48 = vadd.f32 %v3177_v42, %v2117_v47  ;;  %v2119_v49 = vpop.f32.mrb[3].mxu0  ;;  %v2192_v51 = vmax.f32 %v3174_v43, 0.0  ;;  %v3195_v43 = vadd.f32 %v4529_v11, %v4576_v38 }
 0x1a3   : > { %v3180_v50 = vadd.f32 %v3179_v45, %v2119_v49  ;;  %v2193_v53 = vmax.f32 %v3176_v46, 0.0 }
 0x1a4   : > { %v2194_v52 = vmax.f32 %v3178_v48, 0.0 }
 0x1a5   : > { %v2195_v54 = vmax.f32 %v3180_v50, 0.0 }
 0x1a6   : > { %v2224_v56 = vpack.c.bf16 %v2194_v52, %v2192_v51  ;;  %v3197_v51 = vadd.f32 %v4531_v12, %v4572_v36  ;;  %v3199_v52 = vadd.f32 %v4533_v13, %v4576_v38 }
 0x1a7   : > { %v2225_v58 = vpack.c.bf16 %v2195_v54, %v2193_v53  ;;  %v2123_v59 = vpop.f32.mrb[4].mxu0  ;;  %v3201_v54 = vadd.f32 %v4535_v14, %v4572_v36 }
 0x1a8   : > { %v3182_v61 = vadd.f32 %v3181_v55, %v2123_v59  ;;  %v2125_v62 = vpop.f32.mrb[5].mxu0 }
 0x1a9   : > { %v3184_v0 = vadd.f32 %v3183_v57, %v2125_v62  ;;  %v2127_v1 = vpop.f32.mrb[6].mxu0  ;;  %2407 = vmatprep.mubr.bf16.mxu1 %v2225_v58  ;;  %v3203_v57 = vadd.f32 %v4537_v15, %v4576_v38 }
 0x1aa   : > { %v3186_v2 = vadd.f32 %v3185_v60, %v2127_v1  ;;  %v2129_v3 = vpop.f32.mrb[7].mxu0  ;;  %2408 = vmatmul.mubr.bf16.vlgmr.msra.gmra.mrb[32].mxu1 %v2224_v56  ;;  %v2196_v28 = vmax.f32 %v3182_v61, 0.0  ;;  %v3205_v1 = vadd.f32 %v4539_v16, %v4572_v36 }
 0x1ab   : > { %v3188_v24 = vadd.f32 %v3187_v63, %v2129_v3  ;;  %v2197_v30 = vmax.f32 %v3184_v0, 0.0 }
 0x1ac   : > { %v2198_v4 = vmax.f32 %v3186_v2, 0.0  ;;  %v3207_v2 = vadd.f32 %v4541_v17, %v4576_v38 }
 0x1ad   : > { %v2199_v31 = vmax.f32 %v3188_v24, 0.0  ;;  %v3209_v24 = vadd.f32 %v4543_v18, %v4572_v36 }
 0x1ae   : > { %v2226_v32 = vpack.c.bf16 %v2198_v4, %v2196_v28 }
 0x1af   : > { %v2227_v39 = vpack.c.bf16 %v2199_v31, %v2197_v30  ;;  %v2133_v7 = vpop.f32.mrb[8].mxu0  ;;  %v3211_v30 = vadd.f32 %v4545_v19, %v4576_v38 }
 0x1b0   : > { %v3190_v41 = vadd.f32 %v3189_v5, %v2133_v7  ;;  %v2135_v42 = vpop.f32.mrb[9].mxu0 }
 0x1b1   : > { %v3192_v44 = vadd.f32 %v3191_v6, %v2135_v42  ;;  %v2137_v45 = vpop.f32.mrb[10].mxu0  ;;  %2415 = vmatprep.mubr.bf16.mxu1 %v2227_v39  ;;  %v3215_v42 = vadd.f32 %v4549_v21, %v4576_v38 }
 0x1b2   : > { %v3194_v46 = vadd.f32 %v3193_v40, %v2137_v45  ;;  %v2139_v47 = vpop.f32.mrb[11].mxu0  ;;  %2416 = vmatmul.mubr.bf16.gmra.mrb[36].mxu1 %v2226_v32  ;;  %v2200_v48 = vmax.f32 %v3190_v41, 0.0  ;;  %v3213_v41 = vadd.f32 %v4547_v20, %v4572_v36 }
 0x1b3   : > { %v3196_v8 = vadd.f32 %v3195_v43, %v2139_v47  ;;  %v2201_v9 = vmax.f32 %v3192_v44, 0.0  ;;  %v3217_v44 = vadd.f32 %v4551_v22, %v4572_v36  ;;  %v3219_v47 = vadd.f32 %v4553_v23, %v4576_v38 }
 0x1b4   : > { %v2202_v49 = vmax.f32 %v3194_v46, 0.0 }
 0x1b5   : > { %v2203_v50 = vmax.f32 %v3196_v8, 0.0 }
 0x1b6   : > { %v2228_v10 = vpack.c.bf16 %v2202_v49, %v2200_v48 }
 0x1b7   : > { %v2229_v53 = vpack.c.bf16 %v2203_v50, %v2201_v9  ;;  %v2143_v11 = vpop.f32.mrb[12].mxu0 }
 0x1b8   : > { %v3198_v55 = vadd.f32 %v3197_v51, %v2143_v11  ;;  %v2145_v56 = vpop.f32.mrb[13].mxu0 }
 0x1b9   : > { %v3200_v58 = vadd.f32 %v3199_v52, %v2145_v56  ;;  %v2147_v59 = vpop.f32.mrb[14].mxu0  ;;  %2423 = vmatprep.mubr.bf16.mxu1 %v2229_v53  ;;  %v3221_v52 = vadd.f32 %v4555_v25, %v4572_v36  ;;  %v3223_v53 = vadd.f32 %v4557_v26, %v4576_v38 }
 0x1ba   : > { %v3202_v60 = vadd.f32 %v3201_v54, %v2147_v59  ;;  %v2149_v61 = vpop.f32.mrb[15].mxu0  ;;  %2424 = vmatmul.mubr.bf16.gmra.mrb[40].mxu1 %v2228_v10  ;;  %v2204_v62 = vmax.f32 %v3198_v55, 0.0  ;;  %v3225_v54 = vadd.f32 %v4559_v27, %v4572_v36 }
 0x1bb   : > { %v3204_v12 = vadd.f32 %v3203_v57, %v2149_v61  ;;  %v2205_v13 = vmax.f32 %v3200_v58, 0.0  ;;  %v3227_v57 = vadd.f32 %v4561_v29, %v4576_v38 }
 0x1bc   : > { %v2206_v63 = vmax.f32 %v3202_v60, 0.0 }
 0x1bd   : > { %v2207_v0 = vmax.f32 %v3204_v12, 0.0 }
 0x1be   : > { %v2230_v14 = vpack.c.bf16 %v2206_v63, %v2204_v62 }
 0x1bf   : > { %v2231_v3 = vpack.c.bf16 %v2207_v0, %v2205_v13  ;;  %v2153_v15 = vpop.f32.mrb[16].mxu0  ;;  %v3229_v13 = vadd.f32 %v4566_v33, %v4572_v36  ;;  %v3231_v0 = vadd.f32 %v4568_v34, %v4576_v38 }
 0x1c0   : > { %v3206_v28 = vadd.f32 %v3205_v1, %v2153_v15  ;;  %v2155_v4 = vpop.f32.mrb[17].mxu0  ;;  %v3235_v15 = vadd.f32 %v4574_v37, %v4576_v38 }
 0x1c1   : > { %v3208_v31 = vadd.f32 %v3207_v2, %v2155_v4  ;;  %v2157_v5 = vpop.f32.mrb[18].mxu0  ;;  %2431 = vmatprep.mubr.bf16.mxu1 %v2231_v3 }
 0x1c2   : > { %v3210_v32 = vadd.f32 %v3209_v24, %v2157_v5  ;;  %v2159_v6 = vpop.f32.mrb[19].mxu0  ;;  %2432 = vmatmul.mubr.bf16.gmra.mrb[44].mxu1 %v2230_v14  ;;  %v2208_v39 = vmax.f32 %v3206_v28, 0.0  ;;  %v3233_v14 = vadd.f32 %v4570_v35, %v4572_v36 }
 0x1c3   : > { %v3212_v16 = vadd.f32 %v3211_v30, %v2159_v6  ;;  %v2209_v17 = vmax.f32 %v3208_v31, 0.0 }
 0x1c4   : > { %v2210_v7 = vmax.f32 %v3210_v32, 0.0 }
 0x1c5   : > { %v2211_v40 = vmax.f32 %v3212_v16, 0.0 }
 0x1c6   : > { %v2232_v18 = vpack.c.bf16 %v2210_v7, %v2208_v39  ;;  %v4638_v39 = vld [vmem:[%s4773_s4] ss:$0 sm:$0xff] }
 0x1c7   : > { %v2233_v43 = vpack.c.bf16 %v2211_v40, %v2209_v17  ;;  %v2163_v19 = vpop.f32.mrb[20].mxu0 }
 0x1c8   : > { %v3214_v45 = vadd.f32 %v3213_v41, %v2163_v19  ;;  %v2165_v46 = vpop.f32.mrb[21].mxu0 }
 0x1c9   : > { %v3216_v8 = vadd.f32 %v3215_v42, %v2165_v46  ;;  %v2167_v48 = vpop.f32.mrb[22].mxu0  ;;  %2439 = vmatprep.mubr.bf16.mxu1 %v2233_v43 }
 0x1ca   : > { %v3218_v49 = vadd.f32 %v3217_v44, %v2167_v48  ;;  %v2169_v9 = vpop.f32.mrb[23].mxu0  ;;  %2440 = vmatmul.mubr.bf16.gmra.mrb[48].mxu1 %v2232_v18  ;;  %v2212_v50 = vmax.f32 %v3214_v45, 0.0 }
 0x1cb   : > { %v3220_v20 = vadd.f32 %v3219_v47, %v2169_v9  ;;  %v2213_v21 = vmax.f32 %v3216_v8, 0.0 }
 0x1cc   : > { %v2214_v51 = vmax.f32 %v3218_v49, 0.0 }
 0x1cd   : > { %v2215_v10 = vmax.f32 %v3220_v20, 0.0 }
 0x1ce   : > { %v2234_v22 = vpack.c.bf16 %v2214_v51, %v2212_v50 }
 0x1cf   : > { %v2235_v11 = vpack.c.bf16 %v2215_v10, %v2213_v21  ;;  %v2173_v23 = vpop.f32.mrb[24].mxu0 }
 0x1d0   : > { %v3222_v55 = vadd.f32 %v3221_v52, %v2173_v23  ;;  %v2175_v56 = vpop.f32.mrb[25].mxu0 }
 0x1d1   : > { %v3224_v58 = vadd.f32 %v3223_v53, %v2175_v56  ;;  %v2177_v59 = vpop.f32.mrb[26].mxu0  ;;  %2447 = vmatprep.mubr.bf16.mxu1 %v2235_v11 }
 0x1d2   : > { %v3226_v60 = vadd.f32 %v3225_v54, %v2177_v59  ;;  %v2179_v61 = vpop.f32.mrb[27].mxu0  ;;  %2448 = vmatmul.mubr.bf16.gmra.mrb[52].mxu1 %v2234_v22  ;;  %v2216_v12 = vmax.f32 %v3222_v55, 0.0 }
 0x1d3   : > { %v3228_v25 = vadd.f32 %v3227_v57, %v2179_v61  ;;  %v2217_v26 = vmax.f32 %v3224_v58, 0.0 }
 0x1d4   : > { %v2218_v62 = vmax.f32 %v3226_v60, 0.0 }
 0x1d5   : > { %v2219_v63 = vmax.f32 %v3228_v25, 0.0 }
 0x1d6   : > { %v2236_v27 = vpack.c.bf16 %v2218_v62, %v2216_v12 }
 0x1d7   : > { %v2237_v1 = vpack.c.bf16 %v2219_v63, %v2217_v26  ;;  %v2183_v29 = vpop.f32.mrb[28].mxu0 }
 0x1d8   : > { %v3230_v2 = vadd.f32 %v3229_v13, %v2183_v29  ;;  %v2185_v3 = vpop.f32.mrb[29].mxu0 }
 0x1d9   : > { %v3232_v24 = vadd.f32 %v3231_v0, %v2185_v3  ;;  %v2187_v28 = vpop.f32.mrb[30].mxu0  ;;  %2455 = vmatprep.mubr.bf16.mxu1 %v2237_v1 }
 0x1da   : > { %v3234_v4 = vadd.f32 %v3233_v14, %v2187_v28  ;;  %v2189_v33 = vpop.f32.mrb[31].mxu0  ;;  %2456 = vmatmul.mubr.bf16.gmra.mrb[56].mxu1 %v2236_v27  ;;  %v2220_v31 = vmax.f32 %v3230_v2, 0.0 }
 0x1db   : > { %v3236_v30 = vadd.f32 %v3235_v15, %v2189_v33  ;;  %v2221_v5 = vmax.f32 %v3232_v24, 0.0 }
 0x1dc   : > { %v2222_v34 = vmax.f32 %v3234_v4, 0.0 }
 0x1dd   : > { %v2223_v32 = vmax.f32 %v3236_v30, 0.0 }
 0x1de   : > { %v2238_v6 = vpack.c.bf16 %v2222_v34, %v2220_v31 }
 0x1df   : > { %v2239_v16 = vpack.c.bf16 %v2223_v32, %v2221_v5 }
 0x1e1   : > { %2463 = vmatprep.mubr.bf16.mxu1 %v2239_v16 }
 0x1e2   : > { %2464 = vmatmul.mubr.bf16.gmra.mrb[60].mxu1 %v2238_v6 }
 0x27d   : > { %v3125_v35 = vpop.f32.mrb[32].mxu1 }
 0x27e   : > { %v3126_v36 = vpop.f32.mrb[33].mxu1 }
 0x27f   : > { %v3127_v37 = vadd.f32 %v3126_v36, %v3125_v35  ;;  %v3128_v38 = vpop.f32.mrb[34].mxu1 }
 0x280   : > { %v3129_v7 = vpop.f32.mrb[35].mxu1 }
 0x281   : > { %v3130_v17 = vadd.f32 %v3129_v7, %v3128_v38  ;;  %v2410_v40 = vadd.f32 %v3127_v37, %v4638_v39 }
 0x283   : > { %v2413_v41 = vadd.f32 %v3130_v17, %v4638_v39 }
 0x285   : > { %v3065_v18 = vpack.c.bf16 %v2413_v41, %v2410_v40  ;;  %v3131_v42 = vpop.f32.mrb[36].mxu1 }
 0x286   : > { %v3132_v43 = vpop.f32.mrb[37].mxu1 }
 0x287   : > { %3066 = vst [vmem:[%s4642_s16] sm:$0xff] %v3065_v18   ;;  %v3133_v19 = vadd.f32 %v3132_v43, %v3131_v42  ;;  %v3134_v44 = vpop.f32.mrb[38].mxu1 }
 0x288   : > { %v3135_v45 = vpop.f32.mrb[39].mxu1 }
 0x289   : > { %v3136_v46 = vadd.f32 %v3135_v45, %v3134_v44  ;;  %v2418_v47 = vadd.f32 %v3133_v19, %v4638_v39 }
 0x28b   : > { %v2421_v8 = vadd.f32 %v3136_v46, %v4638_v39 }
 0x28d   : > { %v3070_v48 = vpack.c.bf16 %v2421_v8, %v2418_v47  ;;  %v3137_v49 = vpop.f32.mrb[40].mxu1 }
 0x28e   : > { %v3138_v9 = vpop.f32.mrb[41].mxu1 }
 0x28f   : > { %3102 = vst [vmem:[%s4642_s16 + $0x8] sm:$0xff] %v3070_v48   ;;  %v3139_v20 = vadd.f32 %v3138_v9, %v3137_v49  ;;  %v3140_v50 = vpop.f32.mrb[42].mxu1 }
 0x290   : > { %v3141_v51 = vpop.f32.mrb[43].mxu1 }
 0x291   : > { %v3142_v21 = vadd.f32 %v3141_v51, %v3140_v50  ;;  %v2426_v10 = vadd.f32 %v3139_v20, %v4638_v39 }
 0x293   : > { %v2429_v52 = vadd.f32 %v3142_v21, %v4638_v39 }
 0x295   : > { %v3075_v22 = vpack.c.bf16 %v2429_v52, %v2426_v10  ;;  %v3143_v53 = vpop.f32.mrb[44].mxu1 }
 0x296   : > { %v3144_v11 = vpop.f32.mrb[45].mxu1 }
 0x297   : > { %3103 = vst [vmem:[%s4642_s16 + $0x10] sm:$0xff] %v3075_v22   ;;  %v3145_v23 = vadd.f32 %v3144_v11, %v3143_v53  ;;  %v3146_v54 = vpop.f32.mrb[46].mxu1 }
 0x298   : > { %v3147_v55 = vpop.f32.mrb[47].mxu1 }
 0x299   : > { %v3148_v56 = vadd.f32 %v3147_v55, %v3146_v54  ;;  %v2434_v57 = vadd.f32 %v3145_v23, %v4638_v39 }
 0x29b   : > { %v2437_v58 = vadd.f32 %v3148_v56, %v4638_v39 }
 0x29d   : > { %v3080_v59 = vpack.c.bf16 %v2437_v58, %v2434_v57  ;;  %v3149_v60 = vpop.f32.mrb[48].mxu1 }
 0x29e   : > { %v3150_v61 = vpop.f32.mrb[49].mxu1 }
 0x29f   : > { %3104 = vst [vmem:[%s4642_s16 + $0x18] sm:$0xff] %v3080_v59   ;;  %v3151_v25 = vadd.f32 %v3150_v61, %v3149_v60  ;;  %v3152_v12 = vpop.f32.mrb[50].mxu1 }
 0x2a0   : > { %v3153_v62 = vpop.f32.mrb[51].mxu1 }
 0x2a1   : > { %v3154_v26 = vadd.f32 %v3153_v62, %v3152_v12  ;;  %v2442_v63 = vadd.f32 %v3151_v25, %v4638_v39 }
 0x2a3   : > { %v2445_v13 = vadd.f32 %v3154_v26, %v4638_v39 }
 0x2a5   : > { %v3085_v27 = vpack.c.bf16 %v2445_v13, %v2442_v63  ;;  %v3155_v0 = vpop.f32.mrb[52].mxu1 }
 0x2a6   : > { %v3156_v1 = vpop.f32.mrb[53].mxu1 }
 0x2a7   : > { %3105 = vst [vmem:[%s4642_s16 + $0x20] sm:$0xff] %v3085_v27   ;;  %v3157_v29 = vadd.f32 %v3156_v1, %v3155_v0  ;;  %v3158_v14 = vpop.f32.mrb[54].mxu1 }
 0x2a8   : > { %v3159_v2 = vpop.f32.mrb[55].mxu1 }
 0x2a9   : > { %v3160_v3 = vadd.f32 %v3159_v2, %v3158_v14  ;;  %v2450_v15 = vadd.f32 %v3157_v29, %v4638_v39 }
 0x2ab   : > { %v2453_v24 = vadd.f32 %v3160_v3, %v4638_v39 }
 0x2ad   : > { %v3090_v28 = vpack.c.bf16 %v2453_v24, %v2450_v15  ;;  %v3161_v4 = vpop.f32.mrb[56].mxu1 }
 0x2ae   : > { %v3162_v33 = vpop.f32.mrb[57].mxu1 }
 0x2af   : > { %3106 = vst [vmem:[%s4642_s16 + $0x28] sm:$0xff] %v3090_v28   ;;  %v3163_v30 = vadd.f32 %v3162_v33, %v3161_v4  ;;  %v3164_v31 = vpop.f32.mrb[58].mxu1 }
 0x2b0   : > { %v3165_v34 = vpop.f32.mrb[59].mxu1 }
 0x2b1   : > { %v3166_v5 = vadd.f32 %v3165_v34, %v3164_v31  ;;  %v2458_v32 = vadd.f32 %v3163_v30, %v4638_v39 }
 0x2b3   : > { %v2461_v6 = vadd.f32 %v3166_v5, %v4638_v39 }
 0x2b5   : > { %v3095_v16 = vpack.c.bf16 %v2461_v6, %v2458_v32  ;;  %v3167_v35 = vpop.f32.mrb[60].mxu1 }
 0x2b6   : > { %v3168_v36 = vpop.f32.mrb[61].mxu1 }
 0x2b7   : > { %3107 = vst [vmem:[%s4642_s16 + $0x30] sm:$0xff] %v3095_v16   ;;  %v3169_v37 = vadd.f32 %v3168_v36, %v3167_v35  ;;  %v3170_v38 = vpop.f32.mrb[62].mxu1 }
 0x2b8   : > { %v3171_v7 = vpop.f32.mrb[63].mxu1 }
 0x2b9   : > { %v3172_v17 = vadd.f32 %v3171_v7, %v3170_v38  ;;  %v2466_v40 = vadd.f32 %v3169_v37, %v4638_v39  ;;  %2558 = sbr.rel (!%p3821_p4) target bundleno = 763 (0x2fb), region = 44 }
 0x2bb   : > { %v2469_v41 = vadd.f32 %v3172_v17, %v4638_v39 }
 0x2bd   : > { %v3100_v18 = vpack.c.bf16 %v2469_v41, %v2466_v40 }
 0x2bf   : > { %3108 = vst [vmem:[%s4642_s16 + $0x38] sm:$0xff] %v3100_v18  }
 0x2c0   : > { %s4783_s18 = smov (!%p2561_p8, %s2560_s18), 16 }
 0x2c1   : > { %s3028_s29 = sshll.u32 %s4783_s18, 6 }
 0x2c2   : > { %p3031_p9 = scmp.eq.s32.totalorder %s3028_s29, 0 }
 0x2c3   : > { %s4679_s30 = sshrl.u32 (!%p3031_p9), %s4783_s18, 4 }
 0x2c4   : > { %2569 = sbr.rel (%p3031_p9) target bundleno = 763 (0x2fb), region = 48  ;;  %p3032_p10 = scmp.le.s32.totalorder (!%p3031_p9), %s4679_s30, 0 }
 0x2cb   : > { %2782 = sbr.rel (%p3032_p10) target bundleno = 742 (0x2e6), region = 120  ;;  %s4776_s21 = smov (!%p3032_p10), %s4673_s27 }
 0x2cc   : > { %s4777_s26 = smov (!%p3032_p10), %s4642_s16  ;;  %s4688_s28 = smov (!%p3032_p10), 0  }
 0x2cd   : > { %s4690_s6 = smov (!%p3032_p10), 0  }
 0x2d2 LB: >> { %v2585_v39 = vld [vmem:[%s3740_s26] sm:$0xf]  ;;  %v2587_v42 = vld [vmem:[%s3740_s26 + $0x4] sm:$0xf]  ;;  %v2589_v43 = vld [vmem:[%s3740_s26 + $0x8] sm:$0xf]  ;;  %s3748_s6 = sphi %s4690_s6, %s2579_s6   ;;  %s3744_s28 = sphi %s4688_s28, %s4778_s28   ;;  %s3740_s26 = sphi %s4777_s26, %s2622_s26   ;;  %s3736_s21 = sphi %s4776_s21, %s2623_s21  }
 0x2d3   : >> { %2586 = vst [vmem:[%s3736_s21] sm:$0xf] %v2585_v39  ;;  %2588 = vst [vmem:[%s3736_s21 + $0x4] sm:$0xf] %v2587_v42  ;;  %v2591_v19 = vld [vmem:[%s3740_s26 + $0xc] sm:$0xf]  ;;  %s2617_s8 = sadd.s32 1, %s3744_s28 }
 0x2d4   : >> { %2590 = vst [vmem:[%s3736_s21 + $0x8] sm:$0xf] %v2589_v43  ;;  %v2593_v44 = vld [vmem:[%s3740_s26 + $0x10] sm:$0xf]  ;;  %v2595_v45 = vld [vmem:[%s3740_s26 + $0x14] sm:$0xf]  ;;  %p2618_p11 = scmp.ge.s32.totalorder %s2617_s8, %s4679_s30 }
 0x2d5   : >> { %2592 = vst [vmem:[%s3736_s21 + $0xc] sm:$0xf] %v2591_v19  ;;  %2594 = vst [vmem:[%s3736_s21 + $0x10] sm:$0xf] %v2593_v44  ;;  %v2597_v46 = vld [vmem:[%s3740_s26 + $0x18] sm:$0xf] }
 0x2d6   : >> { %2596 = vst [vmem:[%s3736_s21 + $0x14] sm:$0xf] %v2595_v45  ;;  %v2599_v47 = vld [vmem:[%s3740_s26 + $0x1c] sm:$0xf]  ;;  %v2601_v8 = vld [vmem:[%s3740_s26 + $0x20] sm:$0xf] }
 0x2d7   : >> { %2598 = vst [vmem:[%s3736_s21 + $0x18] sm:$0xf] %v2597_v46  ;;  %2600 = vst [vmem:[%s3736_s21 + $0x1c] sm:$0xf] %v2599_v47  ;;  %v2603_v48 = vld [vmem:[%s3740_s26 + $0x24] sm:$0xf] }
 0x2d8   : >> { %2602 = vst [vmem:[%s3736_s21 + $0x20] sm:$0xf] %v2601_v8  ;;  %v2605_v49 = vld [vmem:[%s3740_s26 + $0x28] sm:$0xf]  ;;  %v2607_v9 = vld [vmem:[%s3740_s26 + $0x2c] sm:$0xf] }
 0x2d9   : >> { %2604 = vst [vmem:[%s3736_s21 + $0x24] sm:$0xf] %v2603_v48  ;;  %2606 = vst [vmem:[%s3736_s21 + $0x28] sm:$0xf] %v2605_v49  ;;  %v2609_v20 = vld [vmem:[%s3740_s26 + $0x30] sm:$0xf] }
 0x2da   : >> { %2608 = vst [vmem:[%s3736_s21 + $0x2c] sm:$0xf] %v2607_v9  ;;  %v2611_v50 = vld [vmem:[%s3740_s26 + $0x34] sm:$0xf]  ;;  %v2613_v51 = vld [vmem:[%s3740_s26 + $0x38] sm:$0xf] }
 0x2db   : >> { %2610 = vst [vmem:[%s3736_s21 + $0x30] sm:$0xf] %v2609_v20  ;;  %2612 = vst [vmem:[%s3736_s21 + $0x34] sm:$0xf] %v2611_v50  ;;  %v2615_v21 = vld [vmem:[%s3740_s26 + $0x3c] sm:$0xf] }
 0x2dc   : >> { %2614 = vst [vmem:[%s3736_s21 + $0x38] sm:$0xf] %v2613_v51  ;;  %2616 = vst [vmem:[%s3736_s21 + $0x3c] sm:$0xf] %v2615_v21  ;;  %s4785_s8 = smov (%p2618_p11, %s2617_s8), 0  ;;  %s2579_s6 = sadd.s32 1, %s3748_s6  }
 0x2dd   : >> { %s3033_s9 = sshll.u32 %s4785_s8, 6  ;;  %p2578_p12 = scmp.ge.s32.totalorder %s2579_s6, %s4679_s30 }
 0x2de   : >> { %s2622_s26 = scalar_lea.vmem %s4642_s16, %s3033_s9 [#allocation2]   ;;  %s2623_s21 = scalar_lea.vmem %s4673_s27, %s3033_s9  }
 0x2df   : >> { %s4778_s28 = smov %s4785_s8  ;;  %2581 = sbr.rel (!%p2578_p12) target bundleno = 722 (0x2d2), region = 126 }
 0x2e6 PF: > { %s4751_s7 = sand.u32 15, %s4783_s18   ;;  %s3060_s10 = sshll.u32 %s4679_s30, 6 }
 0x2e7   : > { %s2628_s24 = scalar_lea.vmem %s4642_s16, %s3060_s10 [#allocation2]   ;;  %s2630_s11 = scalar_lea.vmem %s4673_s27, %s3060_s10  }
 0x2e8   : > { %p3038_p13 = scmp.le.s32.totalorder %s4751_s7, 0 }
 0x2e9   : > { %s3750_s12 = smov (!%p3038_p13), %s2630_s11   ;;  %s3754_s13 = smov (!%p3038_p13), %s2628_s24  }
 0x2ea   : > { %2796 = sbr.rel (%p3038_p13) target bundleno = 763 (0x2fb), region = 131  ;;  %s3758_s14 = smov (!%p3038_p13), 0  }
 0x2eb   : > { %s3762_s15 = smov (!%p3038_p13), 0  }
 0x2f1 LB: >> { %v2640_v10 = vld [vmem:[%s3756_s13] sm:$0xf]  ;;  %s2642_s18 = sadd.s32 1, %s3760_s14  ;;  %s2634_s15 = sadd.s32 1, %s3764_s15   ;;  %s3764_s15 = sphi %s3762_s15, %s2634_s15   ;;  %s3760_s14 = sphi %s3758_s14, %s3759_s14   ;;  %s3756_s13 = sphi %s3754_s13, %s2647_s13   ;;  %s3752_s12 = sphi %s3750_s12, %s2648_s12  }
 0x2f2   : >> { %2641 = vst [vmem:[%s3752_s12] sm:$0xf] %v2640_v10  ;;  %p2643_p0 = scmp.ge.s32.totalorder %s2642_s18, %s4751_s7  ;;  %p2633_p1 = scmp.ge.s32.totalorder %s2634_s15, %s4751_s7 }
 0x2f4   : >> { %s4787_s18 = smov (%p2643_p0, %s2642_s18), 0  ;;  %2636 = sbr.rel (!%p2633_p1) target bundleno = 753 (0x2f1), region = 137 }
 0x2f5   : >> { %s3039_s16 = sshll.u32 %s4787_s18, 2  ;;  %s3759_s14 = smov %s4787_s18  }
 0x2f6   : >> { %s2647_s13 = scalar_lea.vmem %s2628_s24, %s3039_s16 [#allocation2]   ;;  %s2648_s12 = scalar_lea.vmem %s2630_s11, %s3039_s16  }
 0x2fb PF: > { %p12_p2 = scmp.ge.s32.totalorder %s3811_s22, 4   ;;  %s4779_s18 = smov %s3728_s19 }
 0x2fc   : > { %s4780_s19 = smov %s3819_s25  ;;  %s4781_s20 = smov %s3811_s22 }
 0x2fd   :  { %14 = sbr.rel (!%p12_p2) target bundleno = 2 (0x2), region = 148 }

</bundles_post_ra>
